<compile_context>
chip_gen: v7x
topology: tpu7x:2x2x1
jax: 0.10.0
libtpu: 0.0.40
codegen_flags: <defaults>
</compile_context>

<pallas_src>
import functools

import jax
import jax.numpy as jnp
from jax.experimental import pallas as pl
from jax.experimental.pallas import tpu as pltpu

LANE = 128  # TPU lane width; all channel-like dims are padded to this.


def encoder_kernel(x_ref, wc_ref, bc_ref, w1_ref, b1_ref, g_ref, be_ref,
                   w2_ref, b2_ref, o_ref, gap_ref, *, tile_h):
    """Fused backbone stand-in + projector MLP.

    Grid axis 0 walks spatial row tiles ("arbitrary": carries a running GAP sum).
      x_ref  : (B, H+2, W+2, Cin) f32  zero-padded NHWC input (whole, VMEM)
      wc_ref : (9*Cin, 128) bf16       im2col conv weight
      bc_ref : (1, 128) f32            conv bias
      w1_ref : (128, 128) bf16         Linear1 weight;  b1/g/be : (1,128) f32
      w2_ref : (128, 128) bf16         Linear2 weight;  b2      : (1,128) f32
      o_ref  : (B, 128) f32            projector output (written on last tile)
      gap_ref: (B, 128) f32            running global-avg-pool sum (scratch)
    """
    t = pl.program_id(0)
    B, Hp, Wp, Cin = x_ref.shape
    H, W = Hp - 2, Wp - 2

    @pl.when(t == 0)
    def _init():
        gap_ref[...] = jnp.zeros_like(gap_ref)

    # --- backbone stand-in: 3x3 "same" conv as ONE im2col matmul (K=9*Cin) ---
    row0 = t * tile_h  # top row of this tile (padded coords = unpadded + dy)
    wins = []
    for dy in range(3):
        for dx in range(3):
            wins.append(x_ref[:, pl.ds(row0 + dy, tile_h), dx:dx + W, :])
    patches = jnp.concatenate(wins, axis=-1).astype(jnp.bfloat16)   # (B,th,W,9*Cin)
    act = jnp.einsum("bhwk,ko->bhwo", patches, wc_ref[...],
                     preferred_element_type=jnp.float32)            # (B,th,W,128)
    act = jnp.maximum(act + bc_ref[0][None, None, None, :], 0.0)    # bias + ReLU
    gap_ref[...] += jnp.sum(act, axis=(1, 2))                       # running GAP sum

    # --- last tile: finish GAP, then projector MLP (Linear-BN-ReLU-Linear) ---
    @pl.when(t == pl.num_programs(0) - 1)
    def _finish():
        feats = gap_ref[...] * (1.0 / float(H * W))   # (B,128); flatten(start_dim=1) is identity
        h = jnp.dot(feats.astype(jnp.bfloat16), w1_ref[...],
                    preferred_element_type=jnp.float32) + b1_ref[...]
        # BatchNorm1d (training mode): one-pass batch stats, biased var, eps=1e-5
        mean = jnp.mean(h, axis=0, keepdims=True)
        var = jnp.maximum(jnp.mean(h * h, axis=0, keepdims=True) - mean * mean, 0.0)
        hn = (h - mean) * jax.lax.rsqrt(var + 1e-5)
        hn = jnp.maximum(hn * g_ref[...] + be_ref[...], 0.0)        # affine + ReLU
        o_ref[...] = jnp.dot(hn.astype(jnp.bfloat16), w2_ref[...],
                             preferred_element_type=jnp.float32) + b2_ref[...]
        # TODO(synk): PyTorch BatchNorm1d also updates running_mean/running_var
        # as a training side-effect; those running stats are not emitted here.


def _pad_to(a, shape):
    return jnp.pad(a, [(0, s - d) for d, s in zip(a.shape, shape)])


@jax.jit
def encoder_forward(x_nchw, params):
    """Encoder.forward: returns the projected encodings (B, projection_size)."""
    B, Cin, H, W = x_nchw.shape
    proj = params["b2"].shape[-1]

    # Layout glue: NCHW -> NHWC (channels on lanes) + 1-px halo for the 3x3
    # "same" conv.  Negligible at these shapes.
    # TODO(synk): at resnet-scale shapes fold the halo/transpose into the
    #             kernel's DMA (index_map clamping) instead of a wrapper pad.
    x = jnp.transpose(x_nchw, (0, 2, 3, 1)).astype(jnp.float32)
    x = jnp.pad(x, ((0, 0), (1, 1), (1, 1), (0, 0)))

    # Lane-dense (128-wide) params; bf16 matmul operands, f32 bias/affine.
    wc = _pad_to(params["conv_w"].reshape(9 * Cin, -1), (9 * Cin, LANE)).astype(jnp.bfloat16)
    bc = _pad_to(params["conv_b"], (1, LANE))
    w1 = _pad_to(params["w1"], (LANE, LANE)).astype(jnp.bfloat16)
    b1 = _pad_to(params["b1"], (1, LANE))
    g = _pad_to(params["gamma"], (1, LANE))
    be = _pad_to(params["beta"], (1, LANE))
    w2 = _pad_to(params["w2"], (LANE, LANE)).astype(jnp.bfloat16)
    b2 = _pad_to(params["b2"], (1, LANE))

    tile_h = 8 if H % 8 == 0 else H
    Hp, Wp = H + 2, W + 2

    out_pad = pl.pallas_call(
        functools.partial(encoder_kernel, tile_h=tile_h),
        out_shape=jax.ShapeDtypeStruct((B, LANE), jnp.float32),
        grid=(H // tile_h,),
        in_specs=[
            pl.BlockSpec((B, Hp, Wp, Cin), lambda t: (0, 0, 0, 0)),
            pl.BlockSpec((9 * Cin, LANE), lambda t: (0, 0)),
            pl.BlockSpec((1, LANE), lambda t: (0, 0)),
            pl.BlockSpec((LANE, LANE), lambda t: (0, 0)),
            pl.BlockSpec((1, LANE), lambda t: (0, 0)),
            pl.BlockSpec((1, LANE), lambda t: (0, 0)),
            pl.BlockSpec((1, LANE), lambda t: (0, 0)),
            pl.BlockSpec((LANE, LANE), lambda t: (0, 0)),
            pl.BlockSpec((1, LANE), lambda t: (0, 0)),
        ],
        out_specs=pl.BlockSpec((B, LANE), lambda t: (0, 0)),
        scratch_shapes=[pltpu.VMEM((B, LANE), jnp.float32)],
        compiler_params=pltpu.CompilerParams(
            dimension_semantics=("arbitrary",),        # GAP/BN carry across tiles
            vmem_limit_bytes=32 * 1024 * 1024),        # fits v7x 64 MiB with headroom
    )(x, wc, bc, w1, b1, g, be, w2, b2)

    return out_pad[:, :proj]


def init_params(key, cin=4, cout=32, hidden=64, proj=32):
    ks = jax.random.split(key, 3)
    return {
        "conv_w": jax.random.normal(ks[0], (3, 3, cin, cout), jnp.float32) * 0.05,
        "conv_b": jnp.zeros((1, cout), jnp.float32),
        "w1": jax.random.normal(ks[1], (cout, hidden), jnp.float32) * 0.05,
        "b1": jnp.zeros((1, hidden), jnp.float32),
        "gamma": jnp.ones((1, hidden), jnp.float32),
        "beta": jnp.zeros((1, hidden), jnp.float32),
        "w2": jax.random.normal(ks[2], (hidden, proj), jnp.float32) * 0.05,
        "b2": jnp.zeros((1, proj), jnp.float32),
    }


if __name__ == "__main__":
    key = jax.random.PRNGKey(0)
    kx, kp = jax.random.split(key)

    # Small shapes: batch=2, channels=4, spatial=16x16 (NCHW like PyTorch).
    x = jax.random.normal(kx, (2, 4, 16, 16), jnp.float32)
    params = init_params(kp, cin=4, cout=32, hidden=64, proj=32)

    out = encoder_forward(x, params)
    out = jax.block_until_ready(out)
    assert out.shape == (2, 32) and out.dtype == jnp.float32
    print("KERNEL_OK")
</pallas_src>

<mosaic_0001>
module attributes {stable_mosaic.version = 11 : i64} {
  func.func @encoder_kernel(%arg0: i32, %arg1: memref<2x18x18x4xf32, #tpu.memory_space<vmem>>, %arg2: memref<36x128xbf16, #tpu.memory_space<vmem>>, %arg3: memref<1x128xf32, #tpu.memory_space<vmem>>, %arg4: memref<128x128xbf16, #tpu.memory_space<vmem>>, %arg5: memref<1x128xf32, #tpu.memory_space<vmem>>, %arg6: memref<1x128xf32, #tpu.memory_space<vmem>>, %arg7: memref<1x128xf32, #tpu.memory_space<vmem>>, %arg8: memref<128x128xbf16, #tpu.memory_space<vmem>>, %arg9: memref<1x128xf32, #tpu.memory_space<vmem>>, %arg10: memref<2x128xf32, #tpu.memory_space<vmem>>, %arg11: memref<2x128xf32, #tpu.memory_space<vmem>>) attributes {dimension_semantics = [#tpu.dimension_semantics<arbitrary>], iteration_bounds = array<i64: 2>, scalar_prefetch = 0 : i64, scratch_operands = 1 : i64, tpu.core_type = #tpu.core_type<tc>, window_params = [{pipeline_mode = #tpu.pipeline_mode<synchronous>, transform_indices = @transform_0, window_bounds = array<i64: 2, 18, 18, 4>}, {pipeline_mode = #tpu.pipeline_mode<synchronous>, transform_indices = @transform_1, window_bounds = array<i64: 36, 128>}, {pipeline_mode = #tpu.pipeline_mode<synchronous>, transform_indices = @transform_2, window_bounds = array<i64: 1, 128>}, {pipeline_mode = #tpu.pipeline_mode<synchronous>, transform_indices = @transform_3, window_bounds = array<i64: 128, 128>}, {pipeline_mode = #tpu.pipeline_mode<synchronous>, transform_indices = @transform_4, window_bounds = array<i64: 1, 128>}, {pipeline_mode = #tpu.pipeline_mode<synchronous>, transform_indices = @transform_5, window_bounds = array<i64: 1, 128>}, {pipeline_mode = #tpu.pipeline_mode<synchronous>, transform_indices = @transform_6, window_bounds = array<i64: 1, 128>}, {pipeline_mode = #tpu.pipeline_mode<synchronous>, transform_indices = @transform_7, window_bounds = array<i64: 128, 128>}, {pipeline_mode = #tpu.pipeline_mode<synchronous>, transform_indices = @transform_8, window_bounds = array<i64: 1, 128>}, {pipeline_mode = #tpu.pipeline_mode<synchronous>, transform_indices = @transform_9, window_bounds = array<i64: 2, 128>}]} {
    %c0_i32 = arith.constant 0 : i32
    %0 = arith.cmpi eq, %arg0, %c0_i32 : i32
    %1 = arith.extui %0 : i1 to i32
    %c0_i32_0 = arith.constant 0 : i32
    %2 = arith.cmpi ne, %1, %c0_i32_0 : i32
    scf.if %2 {
      %cst_44 = arith.constant 0.000000e+00 : f32
      %49 = vector.broadcast %cst_44 : f32 to vector<2x128xf32>
      %c0_45 = arith.constant 0 : index
      %c0_46 = arith.constant 0 : index
      %50 = vector.load %arg11[%c0_45, %c0_46] : memref<2x128xf32, #tpu.memory_space<vmem>>, vector<2x128xf32>
      tpu.vector_store %arg11[%c0_45, %c0_46], %49 {strides = array<i32>} : memref<2x128xf32, #tpu.memory_space<vmem>>, vector<2x128xf32>,
    } else {
    }
    %c8_i32 = arith.constant 8 : i32
    %3 = arith.muli %arg0, %c8_i32 : i32
    %c0_i32_1 = arith.constant 0 : i32
    %4 = arith.addi %3, %c0_i32_1 : i32
    %c0 = arith.constant 0 : index
    %5 = arith.index_cast %4 : i32 to index
    %c0_2 = arith.constant 0 : index
    %c0_3 = arith.constant 0 : index
    %6 = vector.load %arg1[%c0, %5, %c0_2, %c0_3] : memref<2x18x18x4xf32, #tpu.memory_space<vmem>>, vector<2x8x16x4xf32>
    %c0_i32_4 = arith.constant 0 : i32
    %7 = arith.addi %3, %c0_i32_4 : i32
    %c0_5 = arith.constant 0 : index
    %8 = arith.index_cast %7 : i32 to index
    %c1 = arith.constant 1 : index
    %c0_6 = arith.constant 0 : index
    %9 = vector.load %arg1[%c0_5, %8, %c1, %c0_6] : memref<2x18x18x4xf32, #tpu.memory_space<vmem>>, vector<2x8x16x4xf32>
    %c0_i32_7 = arith.constant 0 : i32
    %10 = arith.addi %3, %c0_i32_7 : i32
    %c0_8 = arith.constant 0 : index
    %11 = arith.index_cast %10 : i32 to index
    %c2 = arith.constant 2 : index
    %c0_9 = arith.constant 0 : index
    %12 = vector.load %arg1[%c0_8, %11, %c2, %c0_9] : memref<2x18x18x4xf32, #tpu.memory_space<vmem>>, vector<2x8x16x4xf32>
    %c1_i32 = arith.constant 1 : i32
    %13 = arith.addi %3, %c1_i32 : i32
    %c0_10 = arith.constant 0 : index
    %14 = arith.index_cast %13 : i32 to index
    %c0_11 = arith.constant 0 : index
    %c0_12 = arith.constant 0 : index
    %15 = vector.load %arg1[%c0_10, %14, %c0_11, %c0_12] : memref<2x18x18x4xf32, #tpu.memory_space<vmem>>, vector<2x8x16x4xf32>
    %c1_i32_13 = arith.constant 1 : i32
    %16 = arith.addi %3, %c1_i32_13 : i32
    %c0_14 = arith.constant 0 : index
    %17 = arith.index_cast %16 : i32 to index
    %c1_15 = arith.constant 1 : index
    %c0_16 = arith.constant 0 : index
    %18 = vector.load %arg1[%c0_14, %17, %c1_15, %c0_16] : memref<2x18x18x4xf32, #tpu.memory_space<vmem>>, vector<2x8x16x4xf32>
    %c1_i32_17 = arith.constant 1 : i32
    %19 = arith.addi %3, %c1_i32_17 : i32
    %c0_18 = arith.constant 0 : index
    %20 = arith.index_cast %19 : i32 to index
    %c2_19 = arith.constant 2 : index
    %c0_20 = arith.constant 0 : index
    %21 = vector.load %arg1[%c0_18, %20, %c2_19, %c0_20] : memref<2x18x18x4xf32, #tpu.memory_space<vmem>>, vector<2x8x16x4xf32>
    %c2_i32 = arith.constant 2 : i32
    %22 = arith.addi %3, %c2_i32 : i32
    %c0_21 = arith.constant 0 : index
    %23 = arith.index_cast %22 : i32 to index
    %c0_22 = arith.constant 0 : index
    %c0_23 = arith.constant 0 : index
    %24 = vector.load %arg1[%c0_21, %23, %c0_22, %c0_23] : memref<2x18x18x4xf32, #tpu.memory_space<vmem>>, vector<2x8x16x4xf32>
    %c2_i32_24 = arith.constant 2 : i32
    %25 = arith.addi %3, %c2_i32_24 : i32
    %c0_25 = arith.constant 0 : index
    %26 = arith.index_cast %25 : i32 to index
    %c1_26 = arith.constant 1 : index
    %c0_27 = arith.constant 0 : index
    %27 = vector.load %arg1[%c0_25, %26, %c1_26, %c0_27] : memref<2x18x18x4xf32, #tpu.memory_space<vmem>>, vector<2x8x16x4xf32>
    %c2_i32_28 = arith.constant 2 : i32
    %28 = arith.addi %3, %c2_i32_28 : i32
    %c0_29 = arith.constant 0 : index
    %29 = arith.index_cast %28 : i32 to index
    %c2_30 = arith.constant 2 : index
    %c0_31 = arith.constant 0 : index
    %30 = vector.load %arg1[%c0_29, %29, %c2_30, %c0_31] : memref<2x18x18x4xf32, #tpu.memory_space<vmem>>, vector<2x8x16x4xf32>
    %31 = tpu.concatenate %6, %9, %12, %15, %18, %21, %24, %27, %30 in 3 : vector<2x8x16x4xf32>, vector<2x8x16x4xf32>, vector<2x8x16x4xf32>, vector<2x8x16x4xf32>, vector<2x8x16x4xf32>, vector<2x8x16x4xf32>, vector<2x8x16x4xf32>, vector<2x8x16x4xf32>, vector<2x8x16x4xf32> -> vector<2x8x16x36xf32>
    %32 = arith.truncf %31 : vector<2x8x16x36xf32> to vector<2x8x16x36xbf16>
    %c0_32 = arith.constant 0 : index
    %c0_33 = arith.constant 0 : index
    %33 = vector.load %arg2[%c0_32, %c0_33] : memref<36x128xbf16, #tpu.memory_space<vmem>>, vector<36x128xbf16>
    "tpu.trace_start"() <{level = 10 : i32, message = "bhwk,ko->bhwo"}> : () -> ()
    %cst = arith.constant dense<0.000000e+00> : vector<2x8x16x128xf32>
    %34 = tpu.matmul %32, %33, %cst {dimension_numbers = #tpu.dot_dimension_numbers<[3], [0], [0, 1, 2], [1], [0, 0, 0, 1, 0, 2, 1, 1], [], []>} : vector<2x8x16x36xbf16>, vector<36x128xbf16>, vector<2x8x16x128xf32> -> vector<2x8x16x128xf32>
    "tpu.trace_stop"() : () -> ()
    %c0_34 = arith.constant 0 : index
    %c0_35 = arith.constant 0 : index
    %35 = vector.load %arg3[%c0_34, %c0_35] : memref<1x128xf32, #tpu.memory_space<vmem>>, vector<1x128xf32>
    %36 = vector.shape_cast %35 : vector<1x128xf32> to vector<128xf32>
    %37 = vector.shape_cast %36 : vector<128xf32> to vector<1x1x1x128xf32>
    %38 = vector.broadcast %37 : vector<1x1x1x128xf32> to vector<2x8x16x128xf32>
    %39 = arith.addf %34, %38 : vector<2x8x16x128xf32>
    %cst_36 = arith.constant 0.000000e+00 : f32
    %40 = vector.broadcast %cst_36 : f32 to vector<2x8x16x128xf32>
    %41 = arith.maximumf %39, %40 : vector<2x8x16x128xf32>
    %c0_37 = arith.constant 0 : index
    %c0_38 = arith.constant 0 : index
    %42 = vector.load %arg11[%c0_37, %c0_38] : memref<2x128xf32, #tpu.memory_space<vmem>>, vector<2x128xf32>
    %cst_39 = arith.constant dense<0.000000e+00> : vector<2x128xf32>
    %43 = vector.multi_reduction <add>, %41, %cst_39 [1, 2] : vector<2x8x16x128xf32> to vector<2x128xf32>
    %44 = arith.addf %42, %43 : vector<2x128xf32>
    %c0_40 = arith.constant 0 : index
    %c0_41 = arith.constant 0 : index
    %45 = vector.load %arg11[%c0_40, %c0_41] : memref<2x128xf32, #tpu.memory_space<vmem>>, vector<2x128xf32>
    tpu.vector_store %arg11[%c0_40, %c0_41], %44 {strides = array<i32>} : memref<2x128xf32, #tpu.memory_space<vmem>>, vector<2x128xf32>,
    %c1_i32_42 = arith.constant 1 : i32
    %46 = arith.cmpi eq, %arg0, %c1_i32_42 : i32
    %47 = arith.extui %46 : i1 to i32
    %c0_i32_43 = arith.constant 0 : i32
    %48 = arith.cmpi ne, %47, %c0_i32_43 : i32
    scf.if %48 {
      %c0_44 = arith.constant 0 : index
      %c0_45 = arith.constant 0 : index
      %49 = vector.load %arg11[%c0_44, %c0_45] : memref<2x128xf32, #tpu.memory_space<vmem>>, vector<2x128xf32>
      %cst_46 = arith.constant 3.906250e-03 : f32
      %50 = vector.broadcast %cst_46 : f32 to vector<2x128xf32>
      %51 = arith.mulf %49, %50 : vector<2x128xf32>
      %52 = arith.truncf %51 : vector<2x128xf32> to vector<2x128xbf16>
      %c0_47 = arith.constant 0 : index
      %c0_48 = arith.constant 0 : index
      %53 = vector.load %arg4[%c0_47, %c0_48] : memref<128x128xbf16, #tpu.memory_space<vmem>>, vector<128x128xbf16>
      %cst_49 = arith.constant dense<0.000000e+00> : vector<2x128xf32>
      %54 = tpu.matmul %52, %53, %cst_49 {dimension_numbers = #tpu.dot_dimension_numbers<[1], [0], [0], [1], [0, 0, 1, 1], [], []>} : vector<2x128xbf16>, vector<128x128xbf16>, vector<2x128xf32> -> vector<2x128xf32>
      %c0_50 = arith.constant 0 : index
      %c0_51 = arith.constant 0 : index
      %55 = vector.load %arg5[%c0_50, %c0_51] : memref<1x128xf32, #tpu.memory_space<vmem>>, vector<1x128xf32>
      %56 = vector.broadcast %55 : vector<1x128xf32> to vector<2x128xf32>
      %57 = arith.addf %54, %56 : vector<2x128xf32>
      %cst_52 = arith.constant dense<0.000000e+00> : vector<128xf32>
      %58 = vector.multi_reduction <add>, %57, %cst_52 [0] : vector<2x128xf32> to vector<128xf32>
      %59 = vector.shape_cast %58 : vector<128xf32> to vector<1x128xf32>
      %cst_53 = arith.constant 2.000000e+00 : f32
      %60 = vector.broadcast %cst_53 : f32 to vector<1x128xf32>
      %61 = arith.divf %59, %60 : vector<1x128xf32>
      %62 = arith.mulf %57, %57 : vector<2x128xf32>
      %cst_54 = arith.constant dense<0.000000e+00> : vector<128xf32>
      %63 = vector.multi_reduction <add>, %62, %cst_54 [0] : vector<2x128xf32> to vector<128xf32>
      %64 = vector.shape_cast %63 : vector<128xf32> to vector<1x128xf32>
      %cst_55 = arith.constant 2.000000e+00 : f32
      %65 = vector.broadcast %cst_55 : f32 to vector<1x128xf32>
      %66 = arith.divf %64, %65 : vector<1x128xf32>
      %67 = arith.mulf %61, %61 : vector<1x128xf32>
      %68 = arith.subf %66, %67 : vector<1x128xf32>
      %cst_56 = arith.constant 0.000000e+00 : f32
      %69 = vector.broadcast %cst_56 : f32 to vector<1x128xf32>
      %70 = arith.maximumf %68, %69 : vector<1x128xf32>
      %71 = vector.broadcast %61 : vector<1x128xf32> to vector<2x128xf32>
      %72 = arith.subf %57, %71 : vector<2x128xf32>
      %cst_57 = arith.constant 9.99999974E-6 : f32
      %73 = vector.broadcast %cst_57 : f32 to vector<1x128xf32>
      %74 = arith.addf %70, %73 : vector<1x128xf32>
      %75 = math.rsqrt %74 : vector<1x128xf32>
      %76 = vector.broadcast %75 : vector<1x128xf32> to vector<2x128xf32>
      %77 = arith.mulf %72, %76 : vector<2x128xf32>
      %c0_58 = arith.constant 0 : index
      %c0_59 = arith.constant 0 : index
      %78 = vector.load %arg6[%c0_58, %c0_59] : memref<1x128xf32, #tpu.memory_space<vmem>>, vector<1x128xf32>
      %79 = vector.broadcast %78 : vector<1x128xf32> to vector<2x128xf32>
      %80 = arith.mulf %77, %79 : vector<2x128xf32>
      %c0_60 = arith.constant 0 : index
      %c0_61 = arith.constant 0 : index
      %81 = vector.load %arg7[%c0_60, %c0_61] : memref<1x128xf32, #tpu.memory_space<vmem>>, vector<1x128xf32>
      %82 = vector.broadcast %81 : vector<1x128xf32> to vector<2x128xf32>
      %83 = arith.addf %80, %82 : vector<2x128xf32>
      %cst_62 = arith.constant 0.000000e+00 : f32
      %84 = vector.broadcast %cst_62 : f32 to vector<2x128xf32>
      %85 = arith.maximumf %83, %84 : vector<2x128xf32>
      %86 = arith.truncf %85 : vector<2x128xf32> to vector<2x128xbf16>
      %c0_63 = arith.constant 0 : index
      %c0_64 = arith.constant 0 : index
      %87 = vector.load %arg8[%c0_63, %c0_64] : memref<128x128xbf16, #tpu.memory_space<vmem>>, vector<128x128xbf16>
      %cst_65 = arith.constant dense<0.000000e+00> : vector<2x128xf32>
      %88 = tpu.matmul %86, %87, %cst_65 {dimension_numbers = #tpu.dot_dimension_numbers<[1], [0], [0], [1], [0, 0, 1, 1], [], []>} : vector<2x128xbf16>, vector<128x128xbf16>, vector<2x128xf32> -> vector<2x128xf32>
      %c0_66 = arith.constant 0 : index
      %c0_67 = arith.constant 0 : index
      %89 = vector.load %arg9[%c0_66, %c0_67] : memref<1x128xf32, #tpu.memory_space<vmem>>, vector<1x128xf32>
      %90 = vector.broadcast %89 : vector<1x128xf32> to vector<2x128xf32>
      %91 = arith.addf %88, %90 : vector<2x128xf32>
      %c0_68 = arith.constant 0 : index
      %c0_69 = arith.constant 0 : index
      %92 = vector.load %arg10[%c0_68, %c0_69] : memref<2x128xf32, #tpu.memory_space<vmem>>, vector<2x128xf32>
      tpu.vector_store %arg10[%c0_68, %c0_69], %91 {strides = array<i32>} : memref<2x128xf32, #tpu.memory_space<vmem>>, vector<2x128xf32>,
    } else {
    }
    return
  }
  func.func @transform_0(%arg0: i32) -> (i32, i32, i32, i32) {
    %c0_i32 = arith.constant 0 : i32
    %c0_i32_0 = arith.constant 0 : i32
    %c0_i32_1 = arith.constant 0 : i32
    %c0_i32_2 = arith.constant 0 : i32
    %c0_i32_3 = arith.constant 0 : i32
    return %c0_i32, %c0_i32_0, %c0_i32_1, %c0_i32_2 : i32, i32, i32, i32
  }
  func.func @transform_1(%arg0: i32) -> (i32, i32) {
    %c0_i32 = arith.constant 0 : i32
    %c0_i32_0 = arith.constant 0 : i32
    %c0_i32_1 = arith.constant 0 : i32
    return %c0_i32, %c0_i32_0 : i32, i32
  }
  func.func @transform_2(%arg0: i32) -> (i32, i32) {
    %c0_i32 = arith.constant 0 : i32
    %c0_i32_0 = arith.constant 0 : i32
    %c0_i32_1 = arith.constant 0 : i32
    return %c0_i32, %c0_i32_0 : i32, i32
  }
  func.func @transform_3(%arg0: i32) -> (i32, i32) {
    %c0_i32 = arith.constant 0 : i32
    %c0_i32_0 = arith.constant 0 : i32
    %c0_i32_1 = arith.constant 0 : i32
    return %c0_i32, %c0_i32_0 : i32, i32
  }
  func.func @transform_4(%arg0: i32) -> (i32, i32) {
    %c0_i32 = arith.constant 0 : i32
    %c0_i32_0 = arith.constant 0 : i32
    %c0_i32_1 = arith.constant 0 : i32
    return %c0_i32, %c0_i32_0 : i32, i32
  }
  func.func @transform_5(%arg0: i32) -> (i32, i32) {
    %c0_i32 = arith.constant 0 : i32
    %c0_i32_0 = arith.constant 0 : i32
    %c0_i32_1 = arith.constant 0 : i32
    return %c0_i32, %c0_i32_0 : i32, i32
  }
  func.func @transform_6(%arg0: i32) -> (i32, i32) {
    %c0_i32 = arith.constant 0 : i32
    %c0_i32_0 = arith.constant 0 : i32
    %c0_i32_1 = arith.constant 0 : i32
    return %c0_i32, %c0_i32_0 : i32, i32
  }
  func.func @transform_7(%arg0: i32) -> (i32, i32) {
    %c0_i32 = arith.constant 0 : i32
    %c0_i32_0 = arith.constant 0 : i32
    %c0_i32_1 = arith.constant 0 : i32
    return %c0_i32, %c0_i32_0 : i32, i32
  }
  func.func @transform_8(%arg0: i32) -> (i32, i32) {
    %c0_i32 = arith.constant 0 : i32
    %c0_i32_0 = arith.constant 0 : i32
    %c0_i32_1 = arith.constant 0 : i32
    return %c0_i32, %c0_i32_0 : i32, i32
  }
  func.func @transform_9(%arg0: i32) -> (i32, i32) {
    %c0_i32 = arith.constant 0 : i32
    %c0_i32_0 = arith.constant 0 : i32
    %c0_i32_1 = arith.constant 0 : i32
    return %c0_i32, %c0_i32_0 : i32, i32
  }
}

</mosaic_0001>

<bundles_post_ra>
// kernel: encoder_forward.1
= control target key start
LH: loop header
LB: loop body
LE: loop exit
PB: predicated region body
PF: predicated region fallthrough
CT: control target
= control target key end

     0   :  { %14 = vsyncpa [#allocation4], 0  ;;  %s3711_s30 = smov 0   ;;  %s5006_s0 = inlined_call_operand.vmem [shape: f32[2,18,18,4], index: 0, kind: input, shape index: {}]   ;;  %s5007_s1 = inlined_call_operand.vmem [shape: bf16[36,128], index: 1, kind: input, shape index: {}]   ;;  %s5008_s2 = inlined_call_operand.vmem [shape: f32[1,128], index: 2, kind: input, shape index: {}]   ;;  %s5009_s3 = inlined_call_operand.vmem [shape: bf16[128,128], index: 3, kind: input, shape index: {}]   ;;  %s5010_s4 = inlined_call_operand.vmem [shape: f32[1,128], index: 4, kind: input, shape index: {}]   ;;  %s5011_s5 = inlined_call_operand.vmem [shape: f32[1,128], index: 5, kind: input, shape index: {}]   ;;  %s5012_s6 = inlined_call_operand.vmem [shape: f32[1,128], index: 6, kind: input, shape index: {}]   ;;  %s5013_s7 = inlined_call_operand.vmem [shape: bf16[128,128], index: 7, kind: input, shape index: {}]   ;;  %s5014_s8 = inlined_call_operand.vmem [shape: f32[1,128], index: 8, kind: input, shape index: {}]   ;;  %s5015_s9 = inlined_call_operand.hbm [shape: f32[2,128], index: 9, kind: output, shape index: {}]  }
   0x1 LB: > { %s3717_s10 = sadd.s32 4294967295, %s3647_s30   ;;  %p2548_p0 = scmp.ge.s32.totalorder %s3647_s30, 1  ;;  %s3647_s30 = sphi %s3711_s30, %s20_s30  }
   0x2   : > { %p273_p1 = scmp.lt.s32.totalorder %s3647_s30, 3 }
   0x4   : > { %p274_p2 = pnand %p2548_p0, %p273_p1 }
   0x6   : > { %277 = sbr.rel (%p274_p2) target bundleno = 1151 (0x47f), region = 56 }
   0xd   : > { %p2549_p3 = scmp.ne.s32.totalorder %s3717_s10, 0 }
   0xe   : > { %v3649_v0 = vmov (!%p2549_p3), 0.0  }
   0xf   : > { %303 = sbr.rel (%p2549_p3) target bundleno = 22 (0x16), region = 60  ;;  %304 = vst [vmem:[#allocation2] sm:$0x3] (!%p2549_p3), %v3649_v0 }
  0x16 PF: > { %s2551_s11 = smul.u32 192, %s3717_s10  ;;  %s3650_s15 = smov 4   ;;  %vm1982_vm0 = vcmask 1041408   ;;  %vm1626_vm1 = vcmask 31744   ;;  %vm1659_vm2 = vcmask 64512   ;;  %vm1692_vm3 = vcmask 97280  }
  0x17   : > { %s3651_s16 = smov 8   ;;  %s3652_s17 = smov 12   ;;  %vm1725_vm4 = vcmask 130048   ;;  %vm1758_vm5 = vcmask 162816   ;;  %vm1791_vm6 = vcmask 195584   ;;  %vm1824_vm7 = vcmask 228352  }
  0x18   : > { %s3726_s14 = scalar_lea.vmem %s5006_s0, %s2551_s11  ;;  %s3653_s18 = smov 16   ;;  %vm1857_vm8 = vcmask 261120   ;;  %vm1933_vm9 = vcmask 293888   ;;  %vm2224_vm10 = vcmask 1041409  }
  0x19   : > { %v344_v1 = vld [vmem:[%s3726_s14 + $0x31] sm:$0xff]  ;;  %v345_v2 = vld [vmem:[%s3726_s14 + $0x39] sm:$0xff]  ;;  %v340_v3 = vld [vmem:[%s3726_s14 + $0x1] sm:$0xff]  ;;  %s3654_s19 = smov 20   ;;  %s3655_s22 = smov 24  }
  0x1a   : > { %v3731_v4 = vpack.i.bf16 %v345_v2, %v344_v1  ;;  %v341_v5 = vld [vmem:[%s3726_s14 + $0x9] sm:$0xff]  ;;  %v347_v7 = vld [vmem:[%s3726_s14 + $0x51] sm:$0xff]  ;;  %v342_v9 = vld [vmem:[%s3726_s14 + $0x19] sm:$0xff]  ;;  %s3656_s27 = smov 28   ;;  %s3657_s28 = smov 32  }
  0x1b   : > { %v346_v6 = vld [vmem:[%s3726_s14 + $0x49] sm:$0xff]  ;;  %v2942_v8 = vpack.i.bf16 %v341_v5, %v340_v3  ;;  %v343_v10 = vld [vmem:[%s3726_s14 + $0x21] sm:$0xff]  ;;  %v350_v13 = vld [vmem:[%s3726_s14 + $0x79] sm:$0xff]  ;;  %p2768_p4 = scmp.ne.s32.totalorder %s3717_s10, 1 }
  0x1c   : > { %2953 = vrot.lane.b32.xlu1 %v3731_v4, %s3650_s15  ;;  %v3740_v11 = vpack.i.bf16 %v347_v7, %v346_v6  ;;  %v3743_v12 = vpack.i.bf16 %v343_v10, %v342_v9  ;;  %v351_v14 = vld [vmem:[%s3726_s14 + $0x81] sm:$0xff]  ;;  %v349_v16 = vld [vmem:[%s3726_s14 + $0x69] sm:$0xff]  ;;  %v355_v20 = vld [vmem:[%s3726_s14 + $0xb1] sm:$0xff]  ;;  %vm3659_vm11 = vmmov (!%p2768_p4), 0  }
  0x1d   : > { %2943 = vrot.lane.b32.xlu0 %v2942_v8, %s3650_s15  ;;  %v348_v15 = vld [vmem:[%s3726_s14 + $0x61] sm:$0xff]  ;;  %v3751_v17 = vpack.i.bf16 %v351_v14, %v350_v13  ;;  %v354_v19 = vld [vmem:[%s3726_s14 + $0xa9] sm:$0xff]  ;;  %v352_v21 = vld [vmem:[%s3726_s14 + $0x91] sm:$0xff] }
  0x1e   : > { %v3755_v18 = vpack.i.bf16 %v349_v16, %v348_v15  ;;  %v353_v22 = vld [vmem:[%s3726_s14 + $0x99] sm:$0xff]  ;;  %v2977_v23 = vpack.i.bf16 %v355_v20, %v354_v19  ;;  %v358_v25 = vld [vmem:[%s3726_s14 + $0x1c9] sm:$0xff]  ;;  %v359_v26 = vld [vmem:[%s3726_s14 + $0x1d1] sm:$0xff] }
  0x1f   : > { %v2972_v24 = vpack.i.bf16 %v353_v22, %v352_v21  ;;  %v356_v27 = vld [vmem:[%s3726_s14 + $0x1b1] sm:$0xff]  ;;  %v357_v28 = vld [vmem:[%s3726_s14 + $0x1b9] sm:$0xff]  ;;  %v3770_v29 = vpack.i.bf16 %v359_v26, %v358_v25  ;;  %v363_v32 = vld [vmem:[%s3726_s14 + $0x201] sm:$0xff] }
  0x20   : > { %2958 = vrot.lane.b32.xlu1 %v3740_v11, %s3650_s15  ;;  %v2982_v30 = vpack.i.bf16 %v357_v28, %v356_v27  ;;  %v362_v31 = vld [vmem:[%s3726_s14 + $0x1f9] sm:$0xff]  ;;  %v360_v33 = vld [vmem:[%s3726_s14 + $0x1e1] sm:$0xff]  ;;  %v361_v34 = vld [vmem:[%s3726_s14 + $0x1e9] sm:$0xff] }
  0x21   : > { %2948 = vrot.lane.b32.xlu0 %v3743_v12, %s3650_s15  ;;  %v3779_v35 = vpack.i.bf16 %v363_v32, %v362_v31  ;;  %v3782_v36 = vpack.i.bf16 %v361_v34, %v360_v33  ;;  %v366_v37 = vld [vmem:[%s3726_s14 + $0x229] sm:$0xff]  ;;  %v367_v38 = vld [vmem:[%s3726_s14 + $0x231] sm:$0xff]  ;;  %v365_v40 = vld [vmem:[%s3726_s14 + $0x219] sm:$0xff] }
  0x22   : > { %v364_v39 = vld [vmem:[%s3726_s14 + $0x211] sm:$0xff]  ;;  %v3790_v41 = vpack.i.bf16 %v367_v38, %v366_v37  ;;  %v370_v43 = vld [vmem:[%s3726_s14 + $0x259] sm:$0xff]  ;;  %v371_v44 = vld [vmem:[%s3726_s14 + $0x261] sm:$0xff] }
  0x23   : > { %v3794_v42 = vpack.i.bf16 %v365_v40, %v364_v39  ;;  %v368_v45 = vld [vmem:[%s3726_s14 + $0x241] sm:$0xff]  ;;  %v369_v46 = vld [vmem:[%s3726_s14 + $0x249] sm:$0xff]  ;;  %v3017_v47 = vpack.i.bf16 %v371_v44, %v370_v43  ;;  %v379_v56 = vld [vmem:[%s3726_s14 + $0x52] sm:$0xff] }
  0x24   : > { %2968 = vrot.lane.b32.xlu1 %v3751_v17, %s3650_s15  ;;  %v3804_v48 = vpack.i.bf16 %v369_v46, %v368_v45  ;;  %v374_v49 = vld [vmem:[%s3726_s14 + $0x1a] sm:$0xff]  ;;  %v375_v50 = vld [vmem:[%s3726_s14 + $0x22] sm:$0xff]  ;;  %v373_v52 = vld [vmem:[%s3726_s14 + $0xa] sm:$0xff] }
  0x25   : > { %2963 = vrot.lane.b32.xlu0 %v3755_v18, %s3650_s15  ;;  %v372_v51 = vld [vmem:[%s3726_s14 + $0x2] sm:$0xff]  ;;  %v3811_v53 = vpack.i.bf16 %v375_v50, %v374_v49  ;;  %v378_v55 = vld [vmem:[%s3726_s14 + $0x4a] sm:$0xff]  ;;  %v376_v57 = vld [vmem:[%s3726_s14 + $0x32] sm:$0xff] }
  0x26   : > { %v3022_v54 = vpack.i.bf16 %v373_v52, %v372_v51  ;;  %v377_v58 = vld [vmem:[%s3726_s14 + $0x3a] sm:$0xff]  ;;  %v3821_v59 = vpack.i.bf16 %v379_v56, %v378_v55  ;;  %v383_v62 = vld [vmem:[%s3726_s14 + $0x82] sm:$0xff]  ;;  %v381_v0 = vld [vmem:[%s3726_s14 + $0x6a] sm:$0xff] }
  0x27   : > { %v3824_v60 = vpack.i.bf16 %v377_v58, %v376_v57  ;;  %v382_v61 = vld [vmem:[%s3726_s14 + $0x7a] sm:$0xff]  ;;  %v380_v63 = vld [vmem:[%s3726_s14 + $0x62] sm:$0xff]  ;;  %v386_v3 = vld [vmem:[%s3726_s14 + $0xaa] sm:$0xff] }
  0x28   : > { %2978 = vrot.lane.b32.xlu1 %v2977_v23, %s3650_s15  ;;  %v3832_v1 = vpack.i.bf16 %v383_v62, %v382_v61  ;;  %v3836_v2 = vpack.i.bf16 %v381_v0, %v380_v63  ;;  %v387_v5 = vld [vmem:[%s3726_s14 + $0xb2] sm:$0xff]  ;;  %v385_v7 = vld [vmem:[%s3726_s14 + $0x9a] sm:$0xff]  ;;  %v390_v10 = vld [vmem:[%s3726_s14 + $0x1ca] sm:$0xff] }
  0x29   : > { %2973 = vrot.lane.b32.xlu0 %v2972_v24, %s3650_s15  ;;  %v384_v6 = vld [vmem:[%s3726_s14 + $0x92] sm:$0xff]  ;;  %v3057_v8 = vpack.i.bf16 %v387_v5, %v386_v3  ;;  %v389_v15 = vld [vmem:[%s3726_s14 + $0x1ba] sm:$0xff]  ;;  %v395_v21 = vld [vmem:[%s3726_s14 + $0x202] sm:$0xff] }
  0x2a   : > { %v3846_v9 = vpack.i.bf16 %v385_v7, %v384_v6  ;;  %v391_v13 = vld [vmem:[%s3726_s14 + $0x1d2] sm:$0xff]  ;;  %v394_v20 = vld [vmem:[%s3726_s14 + $0x1fa] sm:$0xff]  ;;  %v392_v22 = vld [vmem:[%s3726_s14 + $0x1e2] sm:$0xff] }
  0x2b   : > { %v388_v14 = vld [vmem:[%s3726_s14 + $0x1b2] sm:$0xff]  ;;  %v3853_v16 = vpack.i.bf16 %v391_v13, %v390_v10  ;;  %v393_v23 = vld [vmem:[%s3726_s14 + $0x1ea] sm:$0xff]  ;;  %v3863_v24 = vpack.i.bf16 %v395_v21, %v394_v20  ;;  %v402_v33 = vld [vmem:[%s3726_s14 + $0x25a] sm:$0xff] }
  0x2c   : > { %2988 = vrot.lane.b32.xlu1 %v3770_v29, %s3650_s15  ;;  %v3062_v19 = vpack.i.bf16 %v389_v15, %v388_v14  ;;  %v3866_v25 = vpack.i.bf16 %v393_v23, %v392_v22  ;;  %v398_v26 = vld [vmem:[%s3726_s14 + $0x22a] sm:$0xff]  ;;  %v399_v27 = vld [vmem:[%s3726_s14 + $0x232] sm:$0xff]  ;;  %v403_v34 = vld [vmem:[%s3726_s14 + $0x262] sm:$0xff] }
  0x2d   : > { %2983 = vrot.lane.b32.xlu0 %v2982_v30, %s3650_s15  ;;  %v396_v28 = vld [vmem:[%s3726_s14 + $0x212] sm:$0xff]  ;;  %v397_v30 = vld [vmem:[%s3726_s14 + $0x21a] sm:$0xff]  ;;  %v3874_v31 = vpack.i.bf16 %v399_v27, %v398_v26  ;;  %v400_v37 = vld [vmem:[%s3726_s14 + $0x242] sm:$0xff]  ;;  %v3097_v39 = vpack.i.bf16 %v403_v34, %v402_v33 }
  0x2e   : > { %v3878_v32 = vpack.i.bf16 %v397_v30, %v396_v28  ;;  %v401_v38 = vld [vmem:[%s3726_s14 + $0x24a] sm:$0xff]  ;;  %v2557_v44 = vld [vmem:[%s3726_s14 + $0x38] sm:$0xff]  ;;  %v3896_v46 = vld [vmem:[%s3726_s14 + $0x20] sm:$0xff] }
  0x2f   : > { %v3888_v40 = vpack.i.bf16 %v401_v38, %v400_v37  ;;  %v2556_v43 = vld [vmem:[%s3726_s14 + $0x30] sm:$0xff]  ;;  %v3893_v45 = vld [vmem:[%s3726_s14 + $0x18] sm:$0xff]  ;;  %v3906_v50 = vld [vmem:[%s3726_s14 + $0x60] sm:$0xff] }
  0x30   : > { %2998 = vrot.lane.b32.xlu1 %v3779_v35, %s3650_s15  ;;  %v3102_v49 = vpack.i.bf16 %v3896_v46, %v3893_v45  ;;  %v3909_v51 = vld [vmem:[%s3726_s14 + $0x68] sm:$0xff]  ;;  %v3921_v57 = vld [vmem:[%s3726_s14 + $0x90] sm:$0xff]  ;;  %v3924_v58 = vld [vmem:[%s3726_s14 + $0x98] sm:$0xff] }
  0x31   : > { %2993 = vrot.lane.b32.xlu0 %v3782_v36, %s3650_s15  ;;  %v2558_v52 = vld [vmem:[%s3726_s14 + $0x48] sm:$0xff]  ;;  %v3917_v55 = vpack.i.bf16 %v3909_v51, %v3906_v50  ;;  %v3927_v61 = vld [vmem:[%s3726_s14 + $0x78] sm:$0xff]  ;;  %v3930_v62 = vld [vmem:[%s3726_s14 + $0x80] sm:$0xff]  ;;  %v3936_v63 = vpack.i.bf16 %v3924_v58, %v3921_v57 }
  0x32   : > { %v3941_v0 = vpack.i.bf16 %v3930_v62, %v3927_v61  ;;  %v2568_v3 = vld [vmem:[%s3726_s14 + $0xc0] sm:$0xff]  ;;  %v2569_v5 = vld [vmem:[%s3726_s14 + $0xc8] sm:$0xff]  ;;  %v3949_v7 = vld [vmem:[%s3726_s14 + $0xb0] sm:$0xff] }
  0x33   : > { %v3946_v6 = vld [vmem:[%s3726_s14 + $0xa8] sm:$0xff]  ;;  %v2572_v13 = vld [vmem:[%s3726_s14 + $0x1e0] sm:$0xff]  ;;  %v3973_v22 = vld [vmem:[%s3726_s14 + $0x210] sm:$0xff] }
  0x34   : > { %3008 = vrot.lane.b32.xlu1 %v3790_v41, %s3650_s15  ;;  %v3957_v10 = vpack.i.bf16 %v3949_v7, %v3946_v6  ;;  %v2573_v14 = vld [vmem:[%s3726_s14 + $0x1e8] sm:$0xff]  ;;  %v3976_v23 = vld [vmem:[%s3726_s14 + $0x218] sm:$0xff]  ;;  %v2575_v27 = vld [vmem:[%s3726_s14 + $0x200] sm:$0xff] }
  0x35   : > { %3003 = vrot.lane.b32.xlu0 %v3794_v42, %s3650_s15  ;;  %v3962_v15 = vld [vmem:[%s3726_s14 + $0x1c8] sm:$0xff]  ;;  %v3147_v20 = vpack.i.bf16 %v2573_v14, %v2572_v13  ;;  %v2574_v26 = vld [vmem:[%s3726_s14 + $0x1f8] sm:$0xff]  ;;  %v3983_v28 = vpack.i.bf16 %v3976_v23, %v3973_v22  ;;  %v3987_v33 = vld [vmem:[%s3726_s14 + $0x240] sm:$0xff] }
  0x36   : > { %v3152_v30 = vpack.i.bf16 %v2575_v27, %v2574_v26  ;;  %v3990_v34 = vld [vmem:[%s3726_s14 + $0x248] sm:$0xff]  ;;  %v3996_v38 = vld [vmem:[%s3726_s14 + $0x230] sm:$0xff] }
  0x37   : > { %v3993_v37 = vld [vmem:[%s3726_s14 + $0x228] sm:$0xff] }
  0x38   : > { %3018 = vrot.lane.b32.xlu1 %v3017_v47, %s3650_s15  ;;  %v3899_v47 = vpack.i.bf16 %v2557_v44, %v2556_v43  ;;  %v4007_v43 = vpack.i.bf16 %v3996_v38, %v3993_v37  ;;  %v3584_v44 = vld [vmem:[%s5007_s1 + $0x10] ss:$0 sps:$4 sm:$0x33]  }
  0x39   : > { %3013 = vrot.lane.b32.xlu0 %v3804_v48, %s3650_s15 }
  0x3c   : > { %3028 = vrot.lane.b32.xlu1 %v3811_v53, %s3651_s16 }
  0x3d   : > { %3023 = vrot.lane.b32.xlu0 %v3022_v54, %s3651_s16  ;;  %v2559_v54 = vld [vmem:[%s3726_s14 + $0x50] sm:$0xff] }
  0x3e   : > { %v3112_v56 = vpack.i.bf16 %v2559_v54, %v2558_v52 }
  0x40   : > { %3038 = vrot.lane.b32.xlu1 %v3821_v59, %s3651_s16 }
  0x41   : > { %3033 = vrot.lane.b32.xlu0 %v3824_v60, %s3651_s16 }
  0x44   : > { %3048 = vrot.lane.b32.xlu1 %v3832_v1, %s3651_s16 }
  0x45   : > { %3043 = vrot.lane.b32.xlu0 %v3836_v2, %s3651_s16 }
  0x48   : > { %3058 = vrot.lane.b32.xlu1 %v3057_v8, %s3651_s16  ;;  %v3137_v8 = vpack.i.bf16 %v2569_v5, %v2568_v3 }
  0x49   : > { %3053 = vrot.lane.b32.xlu0 %v3846_v9, %s3651_s16 }
  0x4c   : > { %3068 = vrot.lane.b32.xlu1 %v3853_v16, %s3651_s16 }
  0x4d   : > { %3063 = vrot.lane.b32.xlu0 %v3062_v19, %s3651_s16  ;;  %v3965_v19 = vld [vmem:[%s3726_s14 + $0x1d0] sm:$0xff] }
  0x4e   : > { %v3142_v21 = vpack.i.bf16 %v3965_v19, %v3962_v15 }
  0x50   : > { %3078 = vrot.lane.b32.xlu1 %v3863_v24, %s3651_s16 }
  0x51   : > { %3073 = vrot.lane.b32.xlu0 %v3866_v25, %s3651_s16 }
  0x54   : > { %3088 = vrot.lane.b32.xlu1 %v3874_v31, %s3651_s16 }
  0x55   : > { %3083 = vrot.lane.b32.xlu0 %v3878_v32, %s3651_s16 }
  0x58   : > { %3098 = vrot.lane.b32.xlu1 %v3097_v39, %s3651_s16  ;;  %v4002_v39 = vpack.i.bf16 %v3990_v34, %v3987_v33 }
  0x59   : > { %3093 = vrot.lane.b32.xlu0 %v3888_v40, %s3651_s16 }
  0x5c   : > { %3108 = vrot.lane.b32.xlu1 %v3899_v47, %s3652_s17 }
  0x5d   : > { %3103 = vrot.lane.b32.xlu0 %v3102_v49, %s3652_s17 }
  0x60   : > { %3118 = vrot.lane.b32.xlu1 %v3917_v55, %s3652_s17 }
  0x61   : > { %3113 = vrot.lane.b32.xlu0 %v3112_v56, %s3652_s17 }
  0x64   : > { %3128 = vrot.lane.b32.xlu1 %v3936_v63, %s3652_s17 }
  0x65   : > { %3123 = vrot.lane.b32.xlu0 %v3941_v0, %s3652_s17 }
  0x68   : > { %3138 = vrot.lane.b32.xlu1 %v3137_v8, %s3652_s17 }
  0x69   : > { %3133 = vrot.lane.b32.xlu0 %v3957_v10, %s3652_s17 }
  0x6c   : > { %3148 = vrot.lane.b32.xlu1 %v3147_v20, %s3652_s17 }
  0x6d   : > { %3143 = vrot.lane.b32.xlu0 %v3142_v21, %s3652_s17 }
  0x70   : > { %3158 = vrot.lane.b32.xlu1 %v3983_v28, %s3652_s17 }
  0x71   : > { %3153 = vrot.lane.b32.xlu0 %v3152_v30, %s3652_s17 }
  0x74   : > { %3168 = vrot.lane.b32.xlu1 %v4002_v39, %s3652_s17 }
  0x75   : > { %3163 = vrot.lane.b32.xlu0 %v4007_v43, %s3652_s17 }
  0x78   : > { %3178 = vrot.lane.b32.xlu1 %v3770_v29, %s3653_s18  ;;  %v3583_v29 = vld [vmem:[%s5007_s1 + $0x8] sm:$0xff]  }
  0x79   : > { %3173 = vrot.lane.b32.xlu0 %v3743_v12, %s3653_s18  ;;  %v3582_v12 = vld [vmem:[%s5007_s1] sm:$0xff]  }
  0x7a   : > { %2830 = vmatprep.subr.bf16.mxu0 %v3582_v12  ;;  %2908 = vmatprep.subr.bf16.mxu1 %v3582_v12 }
  0x7b   : > { %2831 = vmatpush3.bf16.msra.mxu0 %v3582_v12  ;;  %2911 = vmatpush3.bf16.msra.mxu1 %v3582_v12 }
  0x7c   : > { %3188 = vrot.lane.b32.xlu1 %v3782_v36, %s3653_s18  ;;  %2832 = vmatprep.subr.bf16.mxu0 %v3583_v29 }
  0x7d   : > { %3183 = vrot.lane.b32.xlu0 %v3731_v4, %s3653_s18  ;;  %2909 = vmatprep.subr.bf16.mxu1 %v3583_v29 }
  0x7f   : > { %2833 = vmatpush3.bf16.msra.mxu0 %v3583_v29  ;;  %2912 = vmatpush3.bf16.msra.mxu1 %v3583_v29 }
  0x80   : > { %3198 = vrot.lane.b32.xlu1 %v3853_v16, %s3654_s19  ;;  %2914 = vmatprep.subr.msk.bf16.mxu0 %vm1982_vm0, %v3584_v44 }
  0x81   : > { %3193 = vrot.lane.b32.xlu0 %v3811_v53, %s3654_s19  ;;  %2915 = vmatprep.subr.msk.bf16.mxu1 %vm1982_vm0, %v3584_v44 }
  0x84   : > { %3208 = vrot.lane.b32.xlu1 %v3866_v25, %s3654_s19 }
  0x85   : > { %3203 = vrot.lane.b32.xlu0 %v3824_v60, %s3654_s19 }
  0x88   : > { %3218 = vrot.lane.b32.xlu1 %v3147_v20, %s3655_s22 }
  0x89   : > { %3213 = vrot.lane.b32.xlu0 %v3899_v47, %s3655_s22  ;;  %v1984_v47 = vsel %vm1982_vm0, %v3584_v44, 0 }
  0x8a   : > { %2835 = vmatpush3.bf16.msra.mxu0 %v1984_v47  ;;  %2913 = vmatpush3.bf16.msra.mxu1 %v1984_v47 }
  0x8c   : > { %3228 = vrot.lane.b32.xlu1 %v3152_v30, %s3655_s22 }
  0x8d   : > { %3223 = vrot.lane.b32.xlu0 %v3112_v56, %s3655_s22 }
  0x8e   : > { %v4040_v53 = vpop.permute.xlu1 %2953 }
  0x8f   : > { %v4042_v16 = vpop.permute.xlu0 %2943 }
  0x90   : > { %3238 = vrot.lane.b32.xlu1 %v3782_v36, %s3656_s27 }
  0x91   : > { %3233 = vrot.lane.b32.xlu0 %v3731_v4, %s3656_s27 }
  0x92   : > { %v4053_v49 = vpop.permute.xlu1 %2958 }
  0x93   : > { %v4056_v52 = vpop.permute.xlu0 %2948 }
  0x94   : > { %3248 = vrot.lane.b32.xlu1 %v3779_v35, %s3656_s27 }
  0x95   : > { %3243 = vrot.lane.b32.xlu0 %v3740_v11, %s3656_s27 }
  0x96   : > { %v2969_v36 = vpop.permute.xlu1 %2968 }
  0x97   : > { %v2964_v4 = vpop.permute.xlu0 %2963 }
  0x98   : > { %3258 = vrot.lane.b32.xlu1 %v3866_v25, %s3657_s28  ;;  %v2966_v26 = vunpack.i.h.bf16 %v2964_v4  ;;  %v2965_v27 = vunpack.i.l.bf16 %v2964_v4 }
  0x99   : > { %3253 = vrot.lane.b32.xlu0 %v3824_v60, %s3657_s28 }
  0x9a   : > { %v2979_v54 = vpop.permute.xlu1 %2978  ;;  %v1635_v29 = vsel %vm1626_vm1, %v3906_v50, %v2965_v27  ;;  %v1636_v44 = vsel %vm1626_vm1, %v3909_v51, %v2966_v26 }
  0x9b   : > { %v4066_v56 = vpop.permute.xlu0 %2973  ;;  %v2981_v4 = vunpack.i.h.bf16 %v2979_v54 }
  0x9c   : > { %3268 = vrot.lane.b32.xlu1 %v3863_v24, %s3657_s28 }
  0x9d   : > { %3263 = vrot.lane.b32.xlu0 %v3821_v59, %s3657_s28 }
  0x9e   : > { %v4072_v3 = vpop.permute.xlu1 %2988 }
  0x9f   : > { %v4074_v5 = vpop.permute.xlu0 %2983 }
  0xa0   : > { %3278 = vrot.lane.b32.xlu1 %v3779_v35, %s3653_s18 }
  0xa1   : > { %3273 = vrot.lane.b32.xlu0 %v3740_v11, %s3653_s18 }
  0xa2   : > { %v4080_v60 = vpop.permute.xlu1 %2998 }
  0xa3   : > { %v4082_v25 = vpop.permute.xlu0 %2993 }
  0xa4   : > { %3288 = vrot.lane.b32.xlu1 %v3794_v42, %s3653_s18 }
  0xa5   : > { %3283 = vrot.lane.b32.xlu0 %v3755_v18, %s3653_s18 }
  0xa6   : > { %v4088_v8 = vpop.permute.xlu1 %3008 }
  0xa7   : > { %v4090_v13 = vpop.permute.xlu0 %3003 }
  0xa8   : > { %3298 = vrot.lane.b32.xlu1 %v3863_v24, %s3654_s19  ;;  %v2970_v24 = vunpack.i.l.bf16 %v2969_v36 }
  0xa9   : > { %3293 = vrot.lane.b32.xlu0 %v3821_v59, %s3654_s19  ;;  %v2971_v59 = vunpack.i.h.bf16 %v2969_v36 }
  0xaa   : > { %v4096_v11 = vpop.permute.xlu1 %3018 }
  0xab   : > { %v4098_v35 = vpop.permute.xlu0 %3013 }
  0xac   : > { %3308 = vrot.lane.b32.xlu1 %v3878_v32, %s3654_s19 }
  0xad   : > { %3303 = vrot.lane.b32.xlu0 %v3836_v2, %s3654_s19 }
  0xae   : > { %v4104_v14 = vpop.permute.xlu1 %3028 }
  0xaf   : > { %v4106_v20 = vpop.permute.xlu0 %3023 }
  0xb0   : > { %3318 = vrot.lane.b32.xlu1 %v3983_v28, %s3655_s22  ;;  %v1637_v28 = vsel %vm1626_vm1, %v3927_v61, %v2970_v24  ;;  %v2976_v61 = vunpack.i.h.bf16 %v4066_v56 }
  0xb1   : > { %3313 = vrot.lane.b32.xlu0 %v3917_v55, %s3655_s22  ;;  %v1638_v55 = vsel %vm1626_vm1, %v3930_v62, %v2971_v59  ;;  %v2975_v62 = vunpack.i.l.bf16 %v4066_v56 }
  0xb2   : > { %v4112_v21 = vpop.permute.xlu1 %3038 }
  0xb3   : > { %5022 = vst [vmem:[#allocation6_spill] sm:$0xff] %v4112_v21  ;;  %v4114_v30 = vpop.permute.xlu0 %3033 }
  0xb4   : > { %5023 = vst [vmem:[#allocation7_spill] sm:$0xff] %v4114_v30  ;;  %3328 = vrot.lane.b32.xlu1 %v4007_v43, %s3655_s22  ;;  %v2980_v30 = vunpack.i.l.bf16 %v2979_v54 }
  0xb5   : > { %3323 = vrot.lane.b32.xlu0 %v3941_v0, %s3655_s22 }
  0xb6   : > { %v3049_v12 = vpop.permute.xlu1 %3048  ;;  %v1641_v56 = vsel %vm1626_vm1, %v3946_v6, %v2980_v30 }
  0xb7   : > { %v3051_v47 = vunpack.i.h.bf16 %v3049_v12  ;;  %v3050_v43 = vunpack.i.l.bf16 %v3049_v12  ;;  %v3044_v36 = vpop.permute.xlu0 %3043 }
  0xb8   : > { %v3046_v0 = vunpack.i.h.bf16 %v3044_v36  ;;  %v3045_v21 = vunpack.i.l.bf16 %v3044_v36  ;;  %3338 = vrot.lane.b32.xlu1 %v3794_v42, %s3656_s27  ;;  %v2595_v36 = vld [vmem:[%s3726_s14 + $0x81] sm:$0xff] }
  0xb9   : > { %v4133_v59 = vsel %vm1659_vm2, %v1637_v28, %v3050_v43  ;;  %v4136_v50 = vsel %vm1659_vm2, %v1638_v55, %v3051_v47  ;;  %3333 = vrot.lane.b32.xlu0 %v3755_v18, %s3656_s27  ;;  %v1642_v28 = vsel %vm1626_vm1, %v3949_v7, %v2981_v4  ;;  %v1639_v18 = vsel %vm1626_vm1, %v3921_v57, %v2975_v62  ;;  %v2594_v43 = vld [vmem:[%s3726_s14 + $0x79] sm:$0xff]  ;;  %v2596_v62 = vld [vmem:[%s3726_s14 + $0x91] sm:$0xff] }
  0xba   : > { %v4141_v51 = vsel %vm1659_vm2, %v1635_v29, %v3045_v21  ;;  %v4144_v54 = vsel %vm1659_vm2, %v1636_v44, %v3046_v0  ;;  %v3059_v42 = vpop.permute.xlu1 %3058  ;;  %v1640_v21 = vsel %vm1626_vm1, %v3924_v58, %v2976_v61  ;;  %v3011_v44 = vunpack.i.h.bf16 %v4088_v8 }
  0xbb   : > { %v3061_v24 = vunpack.i.h.bf16 %v3059_v42  ;;  %v3060_v26 = vunpack.i.l.bf16 %v3059_v42  ;;  %v3054_v27 = vpop.permute.xlu0 %3053  ;;  %v3006_v4 = vunpack.i.h.bf16 %v4090_v13  ;;  %v3005_v0 = vunpack.i.l.bf16 %v4090_v13  ;;  %v2597_v42 = vld [vmem:[%s3726_s14 + $0x99] sm:$0xff] }
  0xbc   : > { %v3056_v55 = vunpack.i.h.bf16 %v3054_v27  ;;  %v3055_v12 = vunpack.i.l.bf16 %v3054_v27  ;;  %3348 = vrot.lane.b32.xlu1 %v3790_v41, %s3656_s27 }
  0xbd   : > { %v4157_v29 = vsel %vm1659_vm2, %v1641_v56, %v3060_v26  ;;  %v4160_v6 = vsel %vm1659_vm2, %v1642_v28, %v3061_v24  ;;  %3343 = vrot.lane.b32.xlu0 %v3751_v17, %s3656_s27  ;;  %v3010_v17 = vunpack.i.l.bf16 %v4088_v8  ;;  %v1654_v8 = vsel %vm1626_vm1, %v3996_v38, %v3011_v44  ;;  %v338_v38 = vld [vmem:[%s3726_s14 + $0x258] sm:$0xff]  ;;  %v339_v44 = vld [vmem:[%s3726_s14 + $0x260] sm:$0xff] }
  0xbe   : > { %v4165_v7 = vsel %vm1659_vm2, %v1639_v18, %v3055_v12  ;;  %v4168_v30 = vsel %vm1659_vm2, %v1640_v21, %v3056_v55  ;;  %v4170_v57 = vpop.permute.xlu1 %3068  ;;  %v4198_v24 = vpack.i.bf16 %v2597_v42, %v2596_v62  ;;  %v1651_v26 = vsel %vm1626_vm1, %v3973_v22, %v3005_v0 }
  0xbf   : > { %v4172_v58 = vpop.permute.xlu0 %3063  ;;  %v1652_v27 = vsel %vm1626_vm1, %v3976_v23, %v3006_v4  ;;  %v3021_v12 = vunpack.i.h.bf16 %v4096_v11  ;;  %v3020_v18 = vunpack.i.l.bf16 %v4096_v11  ;;  %v3015_v22 = vunpack.i.l.bf16 %v4098_v35 }
  0xc0   : > { %3358 = vrot.lane.b32.xlu1 %v3878_v32, %s3657_s28  ;;  %v1653_v32 = vsel %vm1626_vm1, %v3993_v37, %v3010_v17  ;;  %v3016_v17 = vunpack.i.h.bf16 %v4098_v35 }
  0xc1   : > { %3353 = vrot.lane.b32.xlu0 %v3836_v2, %s3657_s28  ;;  %v3372_v2 = vpack.i.bf16 %v2595_v36, %v2594_v43  ;;  %v1657_v35 = vsel %vm1626_vm1, %v338_v38, %v3020_v18  ;;  %v1658_v42 = vsel %vm1626_vm1, %v339_v44, %v3021_v12 }
  0xc2   : > { %v4180_v47 = vpop.permute.xlu1 %3078 }
  0xc3   : > { %v4186_v61 = vpop.permute.xlu0 %3073 }
  0xc4   : > { %3368 = vrot.lane.b32.xlu1 %v3874_v31, %s3657_s28 }
  0xc5   : > { %3363 = vrot.lane.b32.xlu0 %v3832_v1, %s3657_s28 }
  0xc6   : > { %v3089_v13 = vpop.permute.xlu1 %3088 }
  0xc7   : > { %v3091_v56 = vunpack.i.h.bf16 %v3089_v13  ;;  %v3090_v28 = vunpack.i.l.bf16 %v3089_v13  ;;  %v3084_v55 = vpop.permute.xlu0 %3083 }
  0xc8   : > { %v3086_v37 = vunpack.i.h.bf16 %v3084_v55  ;;  %v3085_v21 = vunpack.i.l.bf16 %v3084_v55  ;;  %3378 = vrot.lane.b32.xlu1 %v3790_v41, %s3653_s18 }
  0xc9   : > { %v4213_v23 = vsel %vm1659_vm2, %v1653_v32, %v3090_v28  ;;  %v4216_v43 = vsel %vm1659_vm2, %v1654_v8, %v3091_v56  ;;  %3373 = vrot.lane.b32.xlu0 %v3372_v2, %s3653_s18  ;;  %v1655_v2 = vsel %vm1626_vm1, %v3987_v33, %v3015_v22  ;;  %v1656_v8 = vsel %vm1626_vm1, %v3990_v34, %v3016_v17 }
  0xca   : > { %v4220_v11 = vsel %vm1659_vm2, %v1651_v26, %v3085_v21  ;;  %v4223_v36 = vsel %vm1659_vm2, %v1652_v27, %v3086_v37  ;;  %v3099_v41 = vpop.permute.xlu1 %3098 }
  0xcb   : > { %v3101_v4 = vunpack.i.h.bf16 %v3099_v41  ;;  %v3100_v0 = vunpack.i.l.bf16 %v3099_v41  ;;  %v3094_v62 = vpop.permute.xlu0 %3093  ;;  %v2709_v41 = vld [vmem:[%s3726_s14 + $0x249] sm:$0xff] }
  0xcc   : > { %v3096_v32 = vunpack.i.h.bf16 %v3094_v62  ;;  %v3095_v13 = vunpack.i.l.bf16 %v3094_v62  ;;  %3388 = vrot.lane.b32.xlu1 %v3804_v48, %s3653_s18 }
  0xcd   : > { %v4234_v26 = vsel %vm1659_vm2, %v1657_v35, %v3100_v0  ;;  %v4237_v27 = vsel %vm1659_vm2, %v1658_v42, %v3101_v4  ;;  %3383 = vrot.lane.b32.xlu0 %v4198_v24, %s3653_s18  ;;  %v2710_v35 = vld [vmem:[%s3726_s14 + $0x259] sm:$0xff]  ;;  %v2711_v42 = vld [vmem:[%s3726_s14 + $0x261] sm:$0xff] }
  0xce   : > { %5024 = vst [vmem:[#allocation8_spill] sm:$0xff] %v4234_v26  ;;  %5025 = vst [vmem:[#allocation9_spill] sm:$0xff] %v4237_v27  ;;  %v4242_v56 = vsel %vm1659_vm2, %v1655_v2, %v3095_v13  ;;  %v4245_v48 = vsel %vm1659_vm2, %v1656_v8, %v3096_v32  ;;  %v4247_v28 = vpop.permute.xlu1 %3108  ;;  %v2694_v2 = vld [vmem:[%s3726_s14 + $0xa9] sm:$0xff]  ;;  %v2946_v27 = vunpack.i.h.bf16 %v4042_v16 }
  0xcf   : > { %5026 = vst [vmem:[#allocation10_spill] sm:$0xff] %v4242_v56  ;;  %5027 = vst [vmem:[#allocation11_spill] sm:$0xff] %v4245_v48  ;;  %v4249_v33 = vpop.permute.xlu0 %3103  ;;  %v4409_v48 = vld [vmem:[%s3726_s14 + $0x291] sm:$0xff]  ;;  %v4412_v56 = vld [vmem:[%s3726_s14 + $0xd9] sm:$0xff] }
  0xd0   : > { %3398 = vrot.lane.b32.xlu1 %v3874_v31, %s3654_s19 }
  0xd1   : > { %3393 = vrot.lane.b32.xlu0 %v3832_v1, %s3654_s19  ;;  %v4265_v1 = vpack.i.bf16 %v339_v44, %v338_v38 }
  0xd2   : > { %v4255_v34 = vpop.permute.xlu1 %3118 }
  0xd3   : > { %5028 = vst [vmem:[#allocation12_spill] sm:$0xff] %v4255_v34  ;;  %v4257_v55 = vpop.permute.xlu0 %3113 }
  0xd4   : > { %5029 = vst [vmem:[#allocation13_spill] sm:$0xff] %v4257_v55  ;;  %3408 = vrot.lane.b32.xlu1 %v3888_v40, %s3654_s19 }
  0xd5   : > { %3403 = vrot.lane.b32.xlu0 %v3846_v9, %s3654_s19  ;;  %v2708_v9 = vld [vmem:[%s3726_s14 + $0x241] sm:$0xff] }
  0xd6   : > { %v3129_v12 = vpop.permute.xlu1 %3128  ;;  %v3437_v62 = vpack.i.bf16 %v2709_v41, %v2708_v9  ;;  %v2743_v41 = vld [vmem:[%s3726_s14 + $0x262] sm:$0xff] }
  0xd7   : > { %v3131_v18 = vunpack.i.h.bf16 %v3129_v12  ;;  %v3130_v37 = vunpack.i.l.bf16 %v3129_v12  ;;  %v3124_v21 = vpop.permute.xlu0 %3123  ;;  %v2741_v12 = vld [vmem:[%s3726_s14 + $0x24a] sm:$0xff] }
  0xd8   : > { %v3126_v31 = vunpack.i.h.bf16 %v3124_v21  ;;  %v3125_v17 = vunpack.i.l.bf16 %v3124_v21  ;;  %3418 = vrot.lane.b32.xlu1 %v4002_v39, %s3655_s22  ;;  %v2725_v21 = vld [vmem:[%s3726_s14 + $0x9a] sm:$0xff] }
  0xd9   : > { %v4269_v22 = vsel %vm1692_vm3, %v4133_v59, %v3130_v37  ;;  %v4273_v40 = vsel %vm1692_vm3, %v4136_v50, %v3131_v18  ;;  %3413 = vrot.lane.b32.xlu0 %v3936_v63, %s3655_s22  ;;  %v2724_v37 = vld [vmem:[%s3726_s14 + $0x92] sm:$0xff] }
  0xda   : > { %5030 = vst [vmem:[#allocation14_spill] sm:$0xff] %v4269_v22  ;;  %5031 = vst [vmem:[#allocation15_spill] sm:$0xff] %v4273_v40  ;;  %v4281_v39 = vsel %vm1692_vm3, %v4141_v51, %v3125_v17  ;;  %v4285_v38 = vsel %vm1692_vm3, %v4144_v54, %v3126_v31  ;;  %v3139_v59 = vpop.permute.xlu1 %3138  ;;  %v3452_v9 = vpack.i.bf16 %v2725_v21, %v2724_v37  ;;  %v2585_v37 = vld [vmem:[%s3726_s14 + $0x278] sm:$0xff]  ;;  %v4415_v40 = vld [vmem:[%s3726_s14 + $0xe1] sm:$0xff] }
  0xdb   : > { %5032 = vst [vmem:[#allocation16_spill] sm:$0xff] %v4281_v39  ;;  %5033 = vst [vmem:[#allocation17_spill] sm:$0xff] %v4285_v38  ;;  %v3141_v44 = vunpack.i.h.bf16 %v3139_v59  ;;  %v3140_v50 = vunpack.i.l.bf16 %v3139_v59  ;;  %v3134_v4 = vpop.permute.xlu0 %3133  ;;  %v309_v22 = vld [vmem:[%s3726_s14 + $0x8] sm:$0xff] }
  0xdc   : > { %v3136_v0 = vunpack.i.h.bf16 %v3134_v4  ;;  %v3135_v63 = vunpack.i.l.bf16 %v3134_v4  ;;  %3428 = vrot.lane.b32.xlu1 %v4265_v1, %s3655_s22 }
  0xdd   : > { %v4291_v51 = vsel %vm1692_vm3, %v4157_v29, %v3140_v50  ;;  %v4295_v54 = vsel %vm1692_vm3, %v4160_v6, %v3141_v44  ;;  %3423 = vrot.lane.b32.xlu0 %v3957_v10, %s3655_s22  ;;  %v2695_v6 = vld [vmem:[%s3726_s14 + $0xb1] sm:$0xff]  ;;  %v4316_v10 = vpack.i.bf16 %v2711_v42, %v2710_v35 }
  0xde   : > { %5034 = vst [vmem:[#allocation18_spill] sm:$0xff] %v4291_v51  ;;  %5035 = vst [vmem:[#allocation19_spill] sm:$0xff] %v4295_v54  ;;  %v4303_v32 = vsel %vm1692_vm3, %v4165_v7, %v3135_v63  ;;  %v4307_v29 = vsel %vm1692_vm3, %v4168_v30, %v3136_v0  ;;  %v4309_v13 = vpop.permute.xlu1 %3148  ;;  %v4320_v7 = vpack.i.bf16 %v2695_v6, %v2694_v2  ;;  %v2740_v30 = vld [vmem:[%s3726_s14 + $0x242] sm:$0xff]  ;;  %v2726_v44 = vld [vmem:[%s3726_s14 + $0xaa] sm:$0xff] }
  0xdf   : > { %5036 = vst [vmem:[#allocation20_spill] sm:$0xff] %v4303_v32  ;;  %5037 = vst [vmem:[#allocation21_spill] sm:$0xff] %v4307_v29  ;;  %v4313_v8 = vpop.permute.xlu0 %3143  ;;  %v3457_v17 = vpack.i.bf16 %v2741_v12, %v2740_v30  ;;  %v2727_v50 = vld [vmem:[%s3726_s14 + $0xb2] sm:$0xff]  ;;  %v4400_v29 = vld [vmem:[%s3726_s14 + $0xe0] sm:$0xff] }
  0xe0   : > { %3438 = vrot.lane.b32.xlu1 %v3437_v62, %s3656_s27  ;;  %v4350_v30 = vpack.i.bf16 %v2727_v50, %v2726_v44  ;;  %v2584_v12 = vld [vmem:[%s3726_s14 + $0x270] sm:$0xff]  ;;  %v2632_v50 = vld [vmem:[%s3726_s14 + $0xc2] sm:$0xff]  ;;  %v4397_v51 = vld [vmem:[%s3726_s14 + $0xd8] sm:$0xff] }
  0xe1   : > { %3433 = vrot.lane.b32.xlu0 %v4198_v24, %s3656_s27  ;;  %v2742_v24 = vld [vmem:[%s3726_s14 + $0x25a] sm:$0xff]  ;;  %v2648_v44 = vld [vmem:[%s3726_s14 + $0x272] sm:$0xff]  ;;  %v4403_v32 = vld [vmem:[%s3726_s14 + $0x289] sm:$0xff] }
  0xe2   : > { %v4324_v18 = vpop.permute.xlu1 %3158  ;;  %v4339_v42 = vpack.i.bf16 %v2743_v41, %v2742_v24  ;;  %v2617_v24 = vld [vmem:[%s3726_s14 + $0x279] sm:$0xff]  ;;  %v2600_v41 = vld [vmem:[%s3726_s14 + $0xc1] sm:$0xff]  ;;  %v4391_v54 = vld [vmem:[%s3726_s14 + $0x290] sm:$0xff] }
  0xe3   : > { %5038 = vst [vmem:[#allocation22_spill] sm:$0xff] %v4324_v18  ;;  %v4328_v31 = vpop.permute.xlu0 %3153  ;;  %v3066_v18 = vunpack.i.h.bf16 %v4172_v58 }
  0xe4   : > { %5039 = vst [vmem:[#allocation23_spill] sm:$0xff] %v4328_v31  ;;  %3448 = vrot.lane.b32.xlu1 %v4316_v10, %s3656_s27 }
  0xe5   : > { %3443 = vrot.lane.b32.xlu0 %v4320_v7, %s3656_s27 }
  0xe6   : > { %v3169_v59 = vpop.permute.xlu1 %3168 }
  0xe7   : > { %v3171_v4 = vunpack.i.h.bf16 %v3169_v59  ;;  %v3170_v0 = vunpack.i.l.bf16 %v3169_v59  ;;  %v3164_v63 = vpop.permute.xlu0 %3163  ;;  %v2601_v59 = vld [vmem:[%s3726_s14 + $0xc9] sm:$0xff] }
  0xe8   : > { %v3166_v62 = vunpack.i.h.bf16 %v3164_v63  ;;  %v3165_v35 = vunpack.i.l.bf16 %v3164_v63  ;;  %3458 = vrot.lane.b32.xlu1 %v3457_v17, %s3657_s28  ;;  %v308_v63 = vld [vmem:[%s3726_s14] sm:$0xff] }
  0xe9   : > { %v4343_v2 = vsel %vm1692_vm3, %v4213_v23, %v3170_v0  ;;  %v4347_v6 = vsel %vm1692_vm3, %v4216_v43, %v3171_v4  ;;  %3453 = vrot.lane.b32.xlu0 %v3452_v9, %s3657_s28  ;;  %v2616_v9 = vld [vmem:[%s3726_s14 + $0x271] sm:$0xff]  ;;  %v4379_v0 = vld [vmem:[%s3726_s14 + $0xc0] sm:$0xff] }
  0xea   : > { %5040 = vst [vmem:[#allocation24_spill] sm:$0xff] %v4343_v2  ;;  %5041 = vst [vmem:[#allocation25_spill] sm:$0xff] %v4347_v6  ;;  %v4356_v21 = vsel %vm1692_vm3, %v4220_v11, %v3165_v35  ;;  %v4360_v23 = vsel %vm1692_vm3, %v4223_v36, %v3166_v62  ;;  %v4362_v43 = vpop.permute.xlu1 %3178  ;;  %v2649_v11 = vld [vmem:[%s3726_s14 + $0x27a] sm:$0xff]  ;;  %v4374_v36 = vpack.i.bf16 %v2585_v37, %v2584_v12  ;;  %v2633_v4 = vld [vmem:[%s3726_s14 + $0xca] sm:$0xff]  ;;  %v2945_v12 = vunpack.i.l.bf16 %v4042_v16 }
  0xeb   : > { %5042 = vst [vmem:[#allocation26_spill] sm:$0xff] %v4356_v21  ;;  %5043 = vst [vmem:[#allocation27_spill] sm:$0xff] %v4360_v23  ;;  %v4364_v17 = vpop.permute.xlu0 %3173  ;;  %v4385_v62 = vld [vmem:[%s3726_s14 + $0xc8] sm:$0xff]  ;;  %v4420_v6 = vpack.i.bf16 %v2617_v24, %v2616_v9  ;;  %v4422_v2 = vpack.i.bf16 %v2601_v59, %v2600_v41  ;;  %v4424_v38 = vpack.i.bf16 %v2649_v11, %v2648_v44  ;;  %v2951_v16 = vunpack.i.h.bf16 %v4056_v52  ;;  %v324_v59 = vld [vmem:[%s3726_s14 + $0x1b0] sm:$0xff] }
  0xec   : > { %3468 = vrot.lane.b32.xlu1 %v4339_v42, %s3657_s28  ;;  %v4388_v35 = vld [vmem:[%s3726_s14 + $0x288] sm:$0xff]  ;;  %v4426_v39 = vpack.i.bf16 %v2633_v4, %v2632_v50  ;;  %v2950_v23 = vunpack.i.l.bf16 %v4056_v52  ;;  %v1627_v24 = vsel %vm1626_vm1, %v308_v63, %v2945_v12  ;;  %v1628_v44 = vsel %vm1626_vm1, %v309_v22, %v2946_v27  ;;  %v325_v22 = vld [vmem:[%s3726_s14 + $0x1b8] sm:$0xff] }
  0xed   : > { %3463 = vrot.lane.b32.xlu0 %v4350_v30, %s3657_s28  ;;  %v2991_v11 = vunpack.i.h.bf16 %v4072_v3  ;;  %v2990_v50 = vunpack.i.l.bf16 %v4072_v3  ;;  %v2985_v4 = vunpack.i.l.bf16 %v4074_v5  ;;  %v2986_v12 = vunpack.i.h.bf16 %v4074_v5 }
  0xee   : > { %v4394_v37 = vpop.permute.xlu1 %3188  ;;  %v3031_v9 = vunpack.i.h.bf16 %v4104_v14  ;;  %v3030_v52 = vunpack.i.l.bf16 %v4104_v14  ;;  %v3025_v21 = vunpack.i.l.bf16 %v4106_v20  ;;  %v1629_v27 = vsel %vm1626_vm1, %v3893_v45, %v2950_v23 }
  0xef   : > { %v4406_v26 = vpop.permute.xlu0 %3183  ;;  %v1630_v3 = vsel %vm1626_vm1, %v3896_v46, %v2951_v16  ;;  %v3070_v5 = vunpack.i.l.bf16 %v4170_v57  ;;  %v3071_v14 = vunpack.i.h.bf16 %v4170_v57  ;;  %v3110_v45 = vunpack.i.l.bf16 %v4247_v28 }
  0xf0   : > { %3478 = vrot.lane.b32.xlu1 %v4374_v36, %s3652_s17  ;;  %v1645_v46 = vsel %vm1626_vm1, %v3962_v15, %v2990_v50  ;;  %v1643_v16 = vsel %vm1626_vm1, %v324_v59, %v2985_v4  ;;  %v1644_v31 = vsel %vm1626_vm1, %v325_v22, %v2986_v12  ;;  %v1663_v55 = vsel %vm1659_vm2, %v1630_v3, %v3031_v9 }
  0xf1   : > { %3473 = vrot.lane.b32.xlu0 %v4265_v1, %s3652_s17  ;;  %v3026_v1 = vunpack.i.h.bf16 %v4106_v20  ;;  %v1646_v20 = vsel %vm1626_vm1, %v3965_v19, %v2991_v11  ;;  %v1660_v34 = vsel %vm1659_vm2, %v1627_v24, %v3025_v21  ;;  %v1678_v19 = vsel %vm1659_vm2, %v1645_v46, %v3070_v5 }
  0xf2   : > { %v4437_v41 = vpop.permute.xlu1 %3198  ;;  %v3105_v59 = vunpack.i.l.bf16 %v4249_v33  ;;  %v1677_v21 = vsel %vm1659_vm2, %v1644_v31, %v3066_v18  ;;  %v3146_v50 = vunpack.i.h.bf16 %v4313_v8  ;;  %v3151_v12 = vunpack.i.h.bf16 %v4309_v13 }
  0xf3   : > { %v4449_v63 = vpop.permute.xlu0 %3193  ;;  %v1661_v15 = vsel %vm1659_vm2, %v1628_v44, %v3026_v1  ;;  %v3150_v44 = vunpack.i.l.bf16 %v4309_v13  ;;  %v3180_v18 = vunpack.i.l.bf16 %v4362_v43  ;;  %v3175_v31 = vunpack.i.l.bf16 %v4364_v17 }
  0xf4   : > { %3488 = vrot.lane.b32.xlu1 %v4316_v10, %s3653_s18  ;;  %v3065_v10 = vunpack.i.l.bf16 %v4172_v58  ;;  %v1662_v58 = vsel %vm1659_vm2, %v1629_v27, %v3030_v52  ;;  %v1679_v52 = vsel %vm1659_vm2, %v1646_v20, %v3071_v14  ;;  %v3181_v27 = vunpack.i.h.bf16 %v4362_v43 }
  0xf5   : > { %3483 = vrot.lane.b32.xlu0 %v4320_v7, %s3653_s18  ;;  %v3111_v7 = vunpack.i.h.bf16 %v4247_v28  ;;  %v3106_v28 = vunpack.i.h.bf16 %v4249_v33  ;;  %v1695_v24 = vsel %vm1692_vm3, %v1662_v58, %v3110_v45  ;;  %v3145_v33 = vunpack.i.l.bf16 %v4313_v8 }
  0xf6   : > { %v4471_v23 = vpop.permute.xlu1 %3208  ;;  %v1676_v9 = vsel %vm1659_vm2, %v1643_v16, %v3065_v10  ;;  %v3176_v22 = vunpack.i.h.bf16 %v4364_v17  ;;  %v3190_v8 = vunpack.i.l.bf16 %v4394_v37  ;;  %v3191_v13 = vunpack.i.h.bf16 %v4394_v37 }
  0xf7   : > { %v4479_v57 = vpop.permute.xlu0 %3203  ;;  %v1696_v1 = vsel %vm1692_vm3, %v1663_v55, %v3111_v7  ;;  %v1693_v55 = vsel %vm1692_vm3, %v1660_v34, %v3105_v59  ;;  %v1694_v3 = vsel %vm1692_vm3, %v1661_v15, %v3106_v28  ;;  %v3186_v43 = vunpack.i.h.bf16 %v4406_v26 }
  0xf8   : > { %3498 = vrot.lane.b32.xlu1 %v4420_v6, %s3653_s18  ;;  %v3185_v5 = vunpack.i.l.bf16 %v4406_v26  ;;  %v1711_v34 = vsel %vm1692_vm3, %v1678_v19, %v3150_v44  ;;  %v1709_v10 = vsel %vm1692_vm3, %v1676_v9, %v3145_v33  ;;  %v1710_v17 = vsel %vm1692_vm3, %v1677_v21, %v3146_v50 }
  0xf9   : > { %3493 = vrot.lane.b32.xlu0 %v4422_v2, %s3653_s18  ;;  %v3201_v45 = vunpack.i.h.bf16 %v4437_v41  ;;  %v1742_v37 = vsel %vm1725_vm4, %v1709_v10, %v3180_v18  ;;  %v1743_v26 = vsel %vm1725_vm4, %v1710_v17, %v3181_v27  ;;  %v1726_v20 = vsel %vm1725_vm4, %v1693_v55, %v3175_v31 }
  0xfa   : > { %v4497_v11 = vpop.permute.xlu1 %3218  ;;  %v1727_v16 = vsel %vm1725_vm4, %v1694_v3, %v3176_v22  ;;  %v1744_v7 = vsel %vm1725_vm4, %v1711_v34, %v3190_v8  ;;  %v3195_v58 = vunpack.i.l.bf16 %v4449_v63  ;;  %v1728_v19 = vsel %vm1725_vm4, %v1695_v24, %v3185_v5 }
  0xfb   : > { %v4503_v4 = vpop.permute.xlu0 %3213  ;;  %v1729_v28 = vsel %vm1725_vm4, %v1696_v1, %v3186_v43  ;;  %v1776_v9 = vsel %vm1758_vm5, %v1743_v26, %v3201_v45  ;;  %v3211_v21 = vunpack.i.h.bf16 %v4471_v23  ;;  %v3210_v44 = vunpack.i.l.bf16 %v4471_v23 }
  0xfc   : > { %3508 = vrot.lane.b32.xlu1 %v4339_v42, %s3654_s19  ;;  %v3200_v42 = vunpack.i.l.bf16 %v4437_v41  ;;  %v3196_v41 = vunpack.i.h.bf16 %v4449_v63  ;;  %v3205_v63 = vunpack.i.l.bf16 %v4479_v57  ;;  %v3206_v33 = vunpack.i.h.bf16 %v4479_v57 }
  0xfd   : > { %3503 = vrot.lane.b32.xlu0 %v4350_v30, %s3654_s19  ;;  %v1712_v30 = vsel %vm1692_vm3, %v1679_v52, %v3151_v12  ;;  %v3221_v12 = vunpack.i.h.bf16 %v4497_v11  ;;  %v3220_v24 = vunpack.i.l.bf16 %v4497_v11  ;;  %v3215_v1 = vunpack.i.l.bf16 %v4503_v4 }
  0xfe   : > { %v3229_v14 = vpop.permute.xlu1 %3228  ;;  %v1745_v15 = vsel %vm1725_vm4, %v1712_v30, %v3191_v13  ;;  %v1775_v59 = vsel %vm1758_vm5, %v1742_v37, %v3200_v42  ;;  %v1759_v27 = vsel %vm1758_vm5, %v1726_v20, %v3195_v58  ;;  %v1760_v18 = vsel %vm1758_vm5, %v1727_v16, %v3196_v41 }
  0xff   : > { %v4525_v46 = vpop.permute.xlu0 %3223  ;;  %v3216_v23 = vunpack.i.h.bf16 %v4503_v4  ;;  %v3230_v31 = vunpack.i.l.bf16 %v3229_v14  ;;  %v5044_v57 = vpack.i.bf16 %v4385_v62, %v4379_v0  ;;  %v3231_v55 = vunpack.i.h.bf16 %v3229_v14 }
 0x100   : > { %3518 = vrot.lane.b32.xlu1 %v4424_v38, %s3654_s19  ;;  %v3225_v11 = vunpack.i.l.bf16 %v4525_v46  ;;  %v1778_v13 = vsel %vm1758_vm5, %v1745_v15, %v3211_v21  ;;  %v1761_v43 = vsel %vm1758_vm5, %v1728_v19, %v3205_v63  ;;  %v1762_v42 = vsel %vm1758_vm5, %v1729_v28, %v3206_v33 }
 0x101   : > { %3513 = vrot.lane.b32.xlu0 %v4426_v39, %s3654_s19  ;;  %v1808_v0 = vsel %vm1791_vm6, %v1775_v59, %v3220_v24  ;;  %v1809_v62 = vsel %vm1791_vm6, %v1776_v9, %v3221_v12  ;;  %v1792_v14 = vsel %vm1791_vm6, %v1759_v27, %v3215_v1  ;;  %v5045_v34 = vpack.i.bf16 %v4391_v54, %v4388_v35 }
 0x102   : > { %v3239_v52 = vpop.permute.xlu1 %3238  ;;  %v1793_v10 = vsel %vm1791_vm6, %v1760_v18, %v3216_v23  ;;  %v3226_v45 = vunpack.i.h.bf16 %v4525_v46  ;;  %v5046_v37 = vpack.i.bf16 %v4400_v29, %v4397_v51  ;;  %v1811_v26 = vsel %vm1791_vm6, %v1778_v13, %v3231_v55  ;;  %v2747_v13 = vld [vmem:[%s3726_s14 + $0x292] sm:$0xff] }
 0x103   : > { %v3234_v50 = vpop.permute.xlu0 %3233  ;;  %v3241_v3 = vunpack.i.h.bf16 %v3239_v52  ;;  %v3240_v22 = vunpack.i.l.bf16 %v3239_v52  ;;  %v1794_v20 = vsel %vm1791_vm6, %v1761_v43, %v3225_v11  ;;  %v5047_v55 = vpack.i.bf16 %v4409_v48, %v4403_v32 }
 0x104   : > { %3528 = vrot.lane.b32.xlu1 %v4374_v36, %s3655_s22  ;;  %v1777_v36 = vsel %vm1758_vm5, %v1744_v7, %v3210_v44  ;;  %v3235_v4 = vunpack.i.l.bf16 %v3234_v50  ;;  %v3236_v30 = vunpack.i.h.bf16 %v3234_v50  ;;  %v1795_v44 = vsel %vm1791_vm6, %v1762_v42, %v3226_v45  ;;  %v2731_v42 = vld [vmem:[%s3726_s14 + $0xe2] sm:$0xff] }
 0x105   : > { %3523 = vrot.lane.b32.xlu0 %v5044_v57, %s3655_s22  ;;  %v1810_v17 = vsel %vm1791_vm6, %v1777_v36, %v3230_v31  ;;  %v1841_v54 = vsel %vm1824_vm7, %v1808_v0, %v3240_v22  ;;  %v1842_v35 = vsel %vm1824_vm7, %v1809_v62, %v3241_v3  ;;  %v2746_v36 = vld [vmem:[%s3726_s14 + $0x28a] sm:$0xff]  ;;  %v2960_v45 = vunpack.i.l.bf16 %v4053_v49 }
 0x106   : > { %v3249_v8 = vpop.permute.xlu1 %3248  ;;  %v1825_v46 = vsel %vm1824_vm7, %v1792_v14, %v3235_v4  ;;  %v1826_v52 = vsel %vm1824_vm7, %v1793_v10, %v3236_v30  ;;  %v2955_v10 = vunpack.i.l.bf16 %v4040_v53  ;;  %v3585_v30 = vld [vmem:[%s3726_s14 + $0x30] sm:$0xff] }
 0x107   : > { %v3244_v5 = vpop.permute.xlu0 %3243  ;;  %v3250_v7 = vunpack.i.l.bf16 %v3249_v8  ;;  %v3251_v19 = vunpack.i.h.bf16 %v3249_v8  ;;  %v5048_v8 = vpack.i.bf16 %v4415_v40, %v4412_v56  ;;  %v3577_v56 = vpack.i.bf16 %v2747_v13, %v2746_v36 }
 0x108   : > { %3538 = vrot.lane.b32.xlu1 %v5045_v34, %s3655_s22  ;;  %v3245_v28 = vunpack.i.l.bf16 %v3244_v5  ;;  %v3246_v29 = vunpack.i.h.bf16 %v3244_v5  ;;  %v2730_v5 = vld [vmem:[%s3726_s14 + $0xda] sm:$0xff]  ;;  %v2956_v34 = vunpack.i.h.bf16 %v4040_v53 }
 0x109   : > { %3533 = vrot.lane.b32.xlu0 %v5046_v37, %s3655_s22  ;;  %v1844_v18 = vsel %vm1824_vm7, %v1811_v26, %v3251_v19  ;;  %v3572_v40 = vpack.i.bf16 %v2731_v42, %v2730_v5  ;;  %v1631_v37 = vsel %vm1626_vm1, %v3585_v30, %v2955_v10  ;;  %v3586_v26 = vld [vmem:[%s3726_s14 + $0x38] sm:$0xff]  ;;  %v3588_v19 = vld [vmem:[%s3726_s14 + $0x50] sm:$0xff] }
 0x10a   : > { %v3259_v16 = vpop.permute.xlu1 %3258  ;;  %v1827_v23 = vsel %vm1824_vm7, %v1794_v20, %v3245_v28  ;;  %v1828_v11 = vsel %vm1824_vm7, %v1795_v44, %v3246_v29  ;;  %v1632_v53 = vsel %vm1626_vm1, %v3586_v26, %v2956_v34  ;;  %v3001_v20 = vunpack.i.h.bf16 %v4080_v60  ;;  %v3589_v44 = vld [vmem:[%s3726_s14 + $0x1f8] sm:$0xff]  ;;  %v5053_v5 = vld [vmem:[#allocation23_spill] sm:$0xff] }
 0x10b   : > { %v3261_v41 = vunpack.i.h.bf16 %v3259_v16  ;;  %v3260_v58 = vunpack.i.l.bf16 %v3259_v16  ;;  %v3254_v15 = vpop.permute.xlu0 %3253  ;;  %v3000_v16 = vunpack.i.l.bf16 %v4080_v60  ;;  %v5050_v60 = vld [vmem:[#allocation7_spill] sm:$0xff]  ;;  %v3081_v29 = vunpack.i.h.bf16 %v4180_v47 }
 0x10c   : > { %v3256_v59 = vunpack.i.h.bf16 %v3254_v15  ;;  %v3255_v51 = vunpack.i.l.bf16 %v3254_v15  ;;  %3548 = vrot.lane.b32.xlu1 %v4420_v6, %s3656_s27  ;;  %v1843_v6 = vsel %vm1824_vm7, %v1810_v17, %v3250_v7  ;;  %v5049_v7 = vld [vmem:[#allocation6_spill] sm:$0xff]  ;;  %v3156_v42 = vunpack.i.h.bf16 %v5053_v5 }
 0x10d   : > { %3543 = vrot.lane.b32.xlu0 %v4422_v2, %s3656_s27  ;;  %v1874_v9 = vsel %vm1857_vm8, %v1841_v54, %v3260_v58  ;;  %v1875_v21 = vsel %vm1857_vm8, %v1842_v35, %v3261_v41  ;;  %v2995_v35 = vunpack.i.l.bf16 %v4082_v25  ;;  %v3041_v41 = vunpack.i.h.bf16 %v5049_v7  ;;  %v3587_v15 = vld [vmem:[%s3726_s14 + $0x48] sm:$0xff] }
 0x10e   : > { %v3269_v63 = vpop.permute.xlu1 %3268  ;;  %v1858_v50 = vsel %vm1857_vm8, %v1825_v46, %v3255_v51  ;;  %v1859_v33 = vsel %vm1857_vm8, %v1826_v52, %v3256_v59  ;;  %v1898_v12 = vpack.c.bf16 %v1875_v21, %v1874_v9  ;;  %v3040_v58 = vunpack.i.l.bf16 %v5049_v7 }
 0x10f   : > { %v3271_v24 = vunpack.i.h.bf16 %v3269_v63  ;;  %v3270_v2 = vunpack.i.l.bf16 %v3269_v63  ;;  %v3264_v1 = vpop.permute.xlu0 %3263  ;;  %v1890_v27 = vpack.c.bf16 %v1859_v33, %v1858_v50  ;;  %v1633_v46 = vsel %vm1626_vm1, %v3587_v15, %v2960_v45  ;;  %v3590_v50 = vld [vmem:[%s3726_s14 + $0x200] sm:$0xff] }
 0x110   : > { %v3266_v31 = vunpack.i.h.bf16 %v3264_v1  ;;  %v3265_v57 = vunpack.i.l.bf16 %v3264_v1  ;;  %3558 = vrot.lane.b32.xlu1 %v5047_v55, %s3656_s27  ;;  %2852 = vmatprep.mubr.msk.bf16.mxu1 %vm1933_vm9, %v1898_v12  ;;  %v3036_v59 = vunpack.i.h.bf16 %v5050_v60  ;;  %v3035_v51 = vunpack.i.l.bf16 %v5050_v60  ;;  %v5051_v12 = vld [vmem:[#allocation12_spill] sm:$0xff]  ;;  %v3591_v1 = vld [vmem:[%s3726_s14 + $0x1e0] sm:$0xff] }
 0x111   : > { %v1876_v3 = vsel %vm1857_vm8, %v1843_v6, %v3270_v2  ;;  %v1877_v22 = vsel %vm1857_vm8, %v1844_v18, %v3271_v24  ;;  %3553 = vrot.lane.b32.xlu0 %v5048_v8, %s3656_s27  ;;  %2836 = vmatprep.mubr.msk.bf16.mxu0 %vm1933_vm9, %v1890_v27  ;;  %v3076_v52 = vunpack.i.h.bf16 %v4186_v61  ;;  %v3075_v9 = vunpack.i.l.bf16 %v4186_v61  ;;  %v3592_v27 = vld [vmem:[%s3726_s14 + $0x1e8] sm:$0xff]  ;;  %v5052_v55 = vld [vmem:[#allocation13_spill] sm:$0xff] }
 0x112   : > { %v1899_v43 = vpack.c.bf16 %v1877_v22, %v1876_v3  ;;  %v1860_v48 = vsel %vm1857_vm8, %v1827_v23, %v3265_v57  ;;  %v1861_v32 = vsel %vm1857_vm8, %v1828_v11, %v3266_v31  ;;  %v4614_v4 = vpop.permute.xlu1 %3278  ;;  %v1649_v63 = vsel %vm1626_vm1, %v3589_v44, %v3000_v16 }
 0x113   : > { %v1891_v0 = vpack.c.bf16 %v1861_v32, %v1860_v48  ;;  %v4618_v62 = vpop.permute.xlu0 %3273  ;;  %v1650_v33 = vsel %vm1626_vm1, %v3590_v50, %v3001_v20  ;;  %v3121_v6 = vunpack.i.h.bf16 %v5051_v12  ;;  %v3120_v24 = vunpack.i.l.bf16 %v5051_v12 }
 0x114   : > { %3568 = vrot.lane.b32.xlu1 %v4424_v38, %s3657_s28  ;;  %2853 = vmatmul.mubr.msk.bf16.vlgmr.msra.gmra.mrb[0].mxu1 %vm1933_vm9, %v1899_v43  ;;  %v2961_v38 = vunpack.i.h.bf16 %v4053_v49  ;;  %v2996_v49 = vunpack.i.h.bf16 %v4082_v25  ;;  %v3080_v25 = vunpack.i.l.bf16 %v4180_v47  ;;  %v1647_v47 = vsel %vm1626_vm1, %v3591_v1, %v2995_v35 }
 0x115   : > { %3563 = vrot.lane.b32.xlu0 %v4426_v39, %s3657_s28  ;;  %2837 = vmatmul.mubr.msk.bf16.vlgmr.msra.gmra.mrb[0].mxu0 %vm1933_vm9, %v1891_v0  ;;  %v1666_v18 = vsel %vm1659_vm2, %v1633_v46, %v3040_v58  ;;  %v1664_v31 = vsel %vm1659_vm2, %v1631_v37, %v3035_v51  ;;  %v1665_v57 = vsel %vm1659_vm2, %v1632_v53, %v3036_v59  ;;  %v3116_v11 = vunpack.i.h.bf16 %v5052_v55 }
 0x116   : > { %v4626_v14 = vpop.permute.xlu1 %3288  ;;  %v1634_v28 = vsel %vm1626_vm1, %v3588_v19, %v2961_v38  ;;  %v1648_v61 = vsel %vm1626_vm1, %v3592_v27, %v2996_v49  ;;  %v3115_v3 = vunpack.i.l.bf16 %v5052_v55  ;;  %v1682_v22 = vsel %vm1659_vm2, %v1649_v63, %v3080_v25 }
 0x117   : > { %v4630_v17 = vpop.permute.xlu0 %3283  ;;  %v1667_v23 = vsel %vm1659_vm2, %v1634_v28, %v3041_v41  ;;  %v1683_v8 = vsel %vm1659_vm2, %v1650_v33, %v3081_v29  ;;  %v1680_v36 = vsel %vm1659_vm2, %v1647_v47, %v3075_v9  ;;  %v1681_v13 = vsel %vm1659_vm2, %v1648_v61, %v3076_v52 }
 0x118   : > { %3578 = vrot.lane.b32.xlu1 %v3577_v56, %s3657_s28  ;;  %v1699_v48 = vsel %vm1692_vm3, %v1666_v18, %v3120_v24  ;;  %v1700_v32 = vsel %vm1692_vm3, %v1667_v23, %v3121_v6  ;;  %v3155_v0 = vunpack.i.l.bf16 %v5053_v5  ;;  %v3281_v38 = vunpack.i.h.bf16 %v4614_v4 }
 0x119   : > { %3573 = vrot.lane.b32.xlu0 %v3572_v40, %s3657_s28  ;;  %v5054_v40 = vld [vmem:[#allocation22_spill] sm:$0xff]  ;;  %v3280_v45 = vunpack.i.l.bf16 %v4614_v4  ;;  %v1697_v30 = vsel %vm1692_vm3, %v1664_v31, %v3115_v3  ;;  %v1698_v37 = vsel %vm1692_vm3, %v1665_v57, %v3116_v11  ;;  %v3276_v26 = vunpack.i.h.bf16 %v4618_v62 }
 0x11a   : > { %v4636_v39 = vpop.permute.xlu1 %3298  ;;  %v3161_v34 = vunpack.i.h.bf16 %v5054_v40  ;;  %v3160_v10 = vunpack.i.l.bf16 %v5054_v40  ;;  %v3275_v53 = vunpack.i.l.bf16 %v4618_v62  ;;  %v3291_v20 = vunpack.i.h.bf16 %v4626_v14 }
 0x11b   : > { %v4644_v54 = vpop.permute.xlu0 %3293  ;;  %v3290_v16 = vunpack.i.l.bf16 %v4626_v14  ;;  %v3286_v49 = vunpack.i.h.bf16 %v4630_v17  ;;  %v3285_v35 = vunpack.i.l.bf16 %v4630_v17  ;;  %v1713_v41 = vsel %vm1692_vm3, %v1680_v36, %v3155_v0 }
 0x11c   : > { %v1714_v4 = vsel %vm1692_vm3, %v1681_v13, %v3156_v42  ;;  %v3301_v58 = vunpack.i.h.bf16 %v4636_v39  ;;  %v3300_v15 = vunpack.i.l.bf16 %v4636_v39  ;;  %v1715_v62 = vsel %vm1692_vm3, %v1682_v22, %v3160_v10 }
 0x11d   : > { %v1716_v19 = vsel %vm1692_vm3, %v1683_v8, %v3161_v34  ;;  %v1746_v14 = vsel %vm1725_vm4, %v1713_v41, %v3280_v45  ;;  %v1747_v28 = vsel %vm1725_vm4, %v1714_v4, %v3281_v38  ;;  %v1730_v17 = vsel %vm1725_vm4, %v1697_v30, %v3275_v53 }
 0x11e   : > { %v4660_v21 = vpop.permute.xlu1 %3308  ;;  %v1731_v60 = vsel %vm1725_vm4, %v1698_v37, %v3276_v26  ;;  %v3296_v59 = vunpack.i.h.bf16 %v4644_v54  ;;  %v3295_v51 = vunpack.i.l.bf16 %v4644_v54  ;;  %v1748_v39 = vsel %vm1725_vm4, %v1715_v62, %v3290_v16 }
 0x11f   : > { %v4668_v2 = vpop.permute.xlu0 %3303  ;;  %v1749_v29 = vsel %vm1725_vm4, %v1716_v19, %v3291_v20  ;;  %v1732_v25 = vsel %vm1725_vm4, %v1699_v48, %v3285_v35  ;;  %v1733_v52 = vsel %vm1725_vm4, %v1700_v32, %v3286_v49  ;;  %v1779_v44 = vsel %vm1758_vm5, %v1746_v14, %v3300_v15 }
 0x120   : > { %v1780_v63 = vsel %vm1758_vm5, %v1747_v28, %v3301_v58  ;;  %v3311_v50 = vunpack.i.h.bf16 %v4660_v21  ;;  %v3310_v33 = vunpack.i.l.bf16 %v4660_v21  ;;  %v3306_v54 = vunpack.i.h.bf16 %v4668_v2 }
 0x121   : > { %v3305_v6 = vunpack.i.l.bf16 %v4668_v2  ;;  %v1763_v47 = vsel %vm1758_vm5, %v1730_v17, %v3295_v51  ;;  %v1764_v27 = vsel %vm1758_vm5, %v1731_v60, %v3296_v59 }
 0x122   : > { %v4684_v43 = vpop.permute.xlu1 %3318  ;;  %v1781_v11 = vsel %vm1758_vm5, %v1748_v39, %v3310_v33  ;;  %v1782_v3 = vsel %vm1758_vm5, %v1749_v29, %v3311_v50  ;;  %v1766_v13 = vsel %vm1758_vm5, %v1733_v52, %v3306_v54 }
 0x123   : > { %v3314_v56 = vpop.permute.xlu0 %3313  ;;  %v3321_v24 = vunpack.i.h.bf16 %v4684_v43  ;;  %v3320_v1 = vunpack.i.l.bf16 %v4684_v43  ;;  %v1765_v36 = vsel %vm1758_vm5, %v1732_v25, %v3305_v6 }
 0x124   : > { %v3316_v61 = vunpack.i.h.bf16 %v3314_v56  ;;  %v3315_v18 = vunpack.i.l.bf16 %v3314_v56 }
 0x125   : > { %v1812_v43 = vsel %vm1791_vm6, %v1779_v44, %v3320_v1  ;;  %v1813_v48 = vsel %vm1791_vm6, %v1780_v63, %v3321_v24 }
 0x126   : > { %v3329_v7 = vpop.permute.xlu1 %3328  ;;  %v1796_v32 = vsel %vm1791_vm6, %v1763_v47, %v3315_v18  ;;  %v1797_v5 = vsel %vm1791_vm6, %v1764_v27, %v3316_v61 }
 0x127   : > { %v4706_v46 = vpop.permute.xlu0 %3323  ;;  %v3331_v23 = vunpack.i.h.bf16 %v3329_v7  ;;  %v3330_v31 = vunpack.i.l.bf16 %v3329_v7 }
 0x128   : > { %v3326_v42 = vunpack.i.h.bf16 %v4706_v46  ;;  %v3325_v0 = vunpack.i.l.bf16 %v4706_v46 }
 0x129   : > { %v1814_v56 = vsel %vm1791_vm6, %v1781_v11, %v3330_v31  ;;  %v1815_v40 = vsel %vm1791_vm6, %v1782_v3, %v3331_v23 }
 0x12a   : > { %v3339_v9 = vpop.permute.xlu1 %3338  ;;  %v1798_v15 = vsel %vm1791_vm6, %v1765_v36, %v3325_v0  ;;  %v1799_v28 = vsel %vm1791_vm6, %v1766_v13, %v3326_v42  ;;  %v5055_v42 = vld [vmem:[#allocation26_spill] sm:$0xff] }
 0x12b   : > { %v3334_v12 = vpop.permute.xlu0 %3333  ;;  %v3341_v57 = vunpack.i.h.bf16 %v3339_v9  ;;  %v3340_v55 = vunpack.i.l.bf16 %v3339_v9 }
 0x12c   : > { %v3336_v2 = vunpack.i.h.bf16 %v3334_v12  ;;  %v3335_v22 = vunpack.i.l.bf16 %v3334_v12 }
 0x12d   : > { %v1845_v34 = vsel %vm1824_vm7, %v1812_v43, %v3340_v55  ;;  %v1846_v10 = vsel %vm1824_vm7, %v1813_v48, %v3341_v57 }
 0x12e   : > { %v3349_v21 = vpop.permute.xlu1 %3348  ;;  %v1829_v45 = vsel %vm1824_vm7, %v1796_v32, %v3335_v22  ;;  %v1830_v30 = vsel %vm1824_vm7, %v1797_v5, %v3336_v2 }
 0x12f   : > { %v3344_v8 = vpop.permute.xlu0 %3343  ;;  %v3351_v20 = vunpack.i.h.bf16 %v3349_v21  ;;  %v3350_v16 = vunpack.i.l.bf16 %v3349_v21 }
 0x130   : > { %v3346_v7 = vunpack.i.h.bf16 %v3344_v8  ;;  %v3345_v41 = vunpack.i.l.bf16 %v3344_v8 }
 0x131   : > { %v1847_v39 = vsel %vm1824_vm7, %v1814_v56, %v3350_v16  ;;  %v1848_v29 = vsel %vm1824_vm7, %v1815_v40, %v3351_v20  ;;  %v5056_v56 = vld [vmem:[#allocation27_spill] sm:$0xff]  ;;  %v5060_v20 = vld [vmem:[#allocation25_spill] sm:$0xff] }
 0x132   : > { %v3359_v38 = vpop.permute.xlu1 %3358  ;;  %v1831_v9 = vsel %vm1824_vm7, %v1798_v15, %v3345_v41  ;;  %v1832_v44 = vsel %vm1824_vm7, %v1799_v28, %v3346_v7  ;;  %v5062_v7 = vld [vmem:[#allocation15_spill] sm:$0xff] }
 0x133   : > { %v3361_v37 = vunpack.i.h.bf16 %v3359_v38  ;;  %v3360_v26 = vunpack.i.l.bf16 %v3359_v38  ;;  %v3354_v53 = vpop.permute.xlu0 %3353  ;;  %v5058_v38 = vld [vmem:[#allocation17_spill] sm:$0xff] }
 0x134   : > { %v3356_v49 = vunpack.i.h.bf16 %v3354_v53  ;;  %v3355_v35 = vunpack.i.l.bf16 %v3354_v53 }
 0x135   : > { %v1878_v4 = vsel %vm1857_vm8, %v1845_v34, %v3360_v26  ;;  %v1879_v58 = vsel %vm1857_vm8, %v1846_v10, %v3361_v37  ;;  %v5057_v34 = vld [vmem:[#allocation16_spill] sm:$0xff] }
 0x136   : > { %v1900_v46 = vpack.c.bf16 %v1879_v58, %v1878_v4  ;;  %v1862_v62 = vsel %vm1857_vm8, %v1829_v45, %v3355_v35  ;;  %v1863_v19 = vsel %vm1857_vm8, %v1830_v30, %v3356_v49  ;;  %v3369_v14 = vpop.permute.xlu1 %3368  ;;  %v5059_v26 = vld [vmem:[#allocation24_spill] sm:$0xff]  ;;  %v5061_v49 = vld [vmem:[#allocation14_spill] sm:$0xff] }
 0x137   : > { %v1892_v17 = vpack.c.bf16 %v1863_v19, %v1862_v62  ;;  %v3371_v60 = vunpack.i.h.bf16 %v3369_v14  ;;  %v3370_v59 = vunpack.i.l.bf16 %v3369_v14  ;;  %v3364_v51 = vpop.permute.xlu0 %3363 }
 0x138   : > { %v3366_v25 = vunpack.i.h.bf16 %v3364_v51  ;;  %v3365_v52 = vunpack.i.l.bf16 %v3364_v51  ;;  %2856 = vmatprep.mubr.msk.bf16.mxu1 %vm1933_vm9, %v1900_v46 }
 0x139   : > { %v1880_v63 = vsel %vm1857_vm8, %v1847_v39, %v3370_v59  ;;  %v1881_v50 = vsel %vm1857_vm8, %v1848_v29, %v3371_v60  ;;  %2840 = vmatprep.mubr.msk.bf16.mxu0 %vm1933_vm9, %v1892_v17 }
 0x13a   : > { %v1901_v33 = vpack.c.bf16 %v1881_v50, %v1880_v63  ;;  %v1864_v12 = vsel %vm1857_vm8, %v1831_v9, %v3365_v52  ;;  %v1865_v54 = vsel %vm1857_vm8, %v1832_v44, %v3366_v25  ;;  %v3379_v6 = vpop.permute.xlu1 %3378 }
 0x13b   : > { %v1893_v24 = vpack.c.bf16 %v1865_v54, %v1864_v12  ;;  %v3374_v1 = vpop.permute.xlu0 %3373  ;;  %v3381_v21 = vunpack.i.h.bf16 %v3379_v6  ;;  %v3380_v11 = vunpack.i.l.bf16 %v3379_v6 }
 0x13c   : > { %2857 = vmatmul.mubr.msk.bf16.gmra.mrb[4].mxu1 %vm1933_vm9, %v1901_v33  ;;  %v3376_v3 = vunpack.i.h.bf16 %v3374_v1  ;;  %v3375_v2 = vunpack.i.l.bf16 %v3374_v1 }
 0x13d   : > { %2841 = vmatmul.mubr.msk.bf16.gmra.mrb[4].mxu0 %vm1933_vm9, %v1893_v24  ;;  %v1750_v0 = vsel %vm1725_vm4, %v5055_v42, %v3380_v11  ;;  %v1751_v40 = vsel %vm1725_vm4, %v5056_v56, %v3381_v21 }
 0x13e   : > { %v3389_v47 = vpop.permute.xlu1 %3388  ;;  %v1734_v10 = vsel %vm1725_vm4, %v5057_v34, %v3375_v2  ;;  %v1735_v45 = vsel %vm1725_vm4, %v5058_v38, %v3376_v3 }
 0x13f   : > { %v3384_v27 = vpop.permute.xlu0 %3383  ;;  %v3391_v22 = vunpack.i.h.bf16 %v3389_v47  ;;  %v3390_v8 = vunpack.i.l.bf16 %v3389_v47 }
 0x140   : > { %v3386_v36 = vunpack.i.h.bf16 %v3384_v27  ;;  %v3385_v13 = vunpack.i.l.bf16 %v3384_v27 }
 0x141   : > { %v1752_v53 = vsel %vm1725_vm4, %v5059_v26, %v3390_v8  ;;  %v1753_v16 = vsel %vm1725_vm4, %v5060_v20, %v3391_v22 }
 0x142   : > { %v3399_v61 = vpop.permute.xlu1 %3398  ;;  %v1736_v35 = vsel %vm1725_vm4, %v5061_v49, %v3385_v13  ;;  %v1737_v41 = vsel %vm1725_vm4, %v5062_v7, %v3386_v36 }
 0x143   : > { %v3394_v18 = vpop.permute.xlu0 %3393  ;;  %v3401_v48 = vunpack.i.h.bf16 %v3399_v61  ;;  %v3400_v32 = vunpack.i.l.bf16 %v3399_v61 }
 0x144   : > { %v3396_v30 = vunpack.i.h.bf16 %v3394_v18  ;;  %v3395_v37 = vunpack.i.l.bf16 %v3394_v18 }
 0x145   : > { %v1783_v58 = vsel %vm1758_vm5, %v1750_v0, %v3400_v32  ;;  %v1784_v15 = vsel %vm1758_vm5, %v1751_v40, %v3401_v48 }
 0x146   : > { %v3409_v23 = vpop.permute.xlu1 %3408  ;;  %v1767_v59 = vsel %vm1758_vm5, %v1734_v10, %v3395_v37  ;;  %v1768_v51 = vsel %vm1758_vm5, %v1735_v45, %v3396_v30 }
 0x147   : > { %v3404_v31 = vpop.permute.xlu0 %3403  ;;  %v3411_v46 = vunpack.i.h.bf16 %v3409_v23  ;;  %v3410_v62 = vunpack.i.l.bf16 %v3409_v23 }
 0x148   : > { %v3406_v14 = vunpack.i.h.bf16 %v3404_v31  ;;  %v3405_v28 = vunpack.i.l.bf16 %v3404_v31 }
 0x149   : > { %v1785_v50 = vsel %vm1758_vm5, %v1752_v53, %v3410_v62  ;;  %v1786_v33 = vsel %vm1758_vm5, %v1753_v16, %v3411_v46 }
 0x14a   : > { %v3419_v57 = vpop.permute.xlu1 %3418  ;;  %v1769_v24 = vsel %vm1758_vm5, %v1736_v35, %v3405_v28  ;;  %v1770_v1 = vsel %vm1758_vm5, %v1737_v41, %v3406_v14 }
 0x14b   : > { %v3414_v55 = vpop.permute.xlu0 %3413  ;;  %v3421_v17 = vunpack.i.h.bf16 %v3419_v57  ;;  %v3420_v60 = vunpack.i.l.bf16 %v3419_v57 }
 0x14c   : > { %v3416_v39 = vunpack.i.h.bf16 %v3414_v55  ;;  %v3415_v29 = vunpack.i.l.bf16 %v3414_v55 }
 0x14d   : > { %v1816_v47 = vsel %vm1791_vm6, %v1783_v58, %v3420_v60  ;;  %v1817_v27 = vsel %vm1791_vm6, %v1784_v15, %v3421_v17 }
 0x14e   : > { %v3429_v43 = vpop.permute.xlu1 %3428  ;;  %v1800_v61 = vsel %vm1791_vm6, %v1767_v59, %v3415_v29  ;;  %v1801_v18 = vsel %vm1791_vm6, %v1768_v51, %v3416_v39 }
 0x14f   : > { %v4764_v5 = vpop.permute.xlu0 %3423  ;;  %v3431_v25 = vunpack.i.h.bf16 %v3429_v43  ;;  %v3430_v52 = vunpack.i.l.bf16 %v3429_v43 }
 0x150   : > { %v3426_v23 = vunpack.i.h.bf16 %v4764_v5  ;;  %v3425_v31 = vunpack.i.l.bf16 %v4764_v5 }
 0x151   : > { %v1818_v57 = vsel %vm1791_vm6, %v1785_v50, %v3430_v52  ;;  %v1819_v55 = vsel %vm1791_vm6, %v1786_v33, %v3431_v25 }
 0x152   : > { %v3439_v4 = vpop.permute.xlu1 %3438  ;;  %v1802_v34 = vsel %vm1791_vm6, %v1769_v24, %v3425_v31  ;;  %v1803_v37 = vsel %vm1791_vm6, %v1770_v1, %v3426_v23 }
 0x153   : > { %v3434_v19 = vpop.permute.xlu0 %3433  ;;  %v3441_v9 = vunpack.i.h.bf16 %v3439_v4  ;;  %v3440_v44 = vunpack.i.l.bf16 %v3439_v4 }
 0x154   : > { %v3436_v12 = vunpack.i.h.bf16 %v3434_v19  ;;  %v3435_v54 = vunpack.i.l.bf16 %v3434_v19 }
 0x155   : > { %v1849_v21 = vsel %vm1824_vm7, %v1816_v47, %v3440_v44  ;;  %v1850_v11 = vsel %vm1824_vm7, %v1817_v27, %v3441_v9 }
 0x156   : > { %v3449_v63 = vpop.permute.xlu1 %3448  ;;  %v1833_v2 = vsel %vm1824_vm7, %v1800_v61, %v3435_v54  ;;  %v1834_v22 = vsel %vm1824_vm7, %v1801_v18, %v3436_v12 }
 0x157   : > { %v3444_v6 = vpop.permute.xlu0 %3443  ;;  %v3451_v43 = vunpack.i.h.bf16 %v3449_v63  ;;  %v3450_v48 = vunpack.i.l.bf16 %v3449_v63 }
 0x158   : > { %v3446_v42 = vunpack.i.h.bf16 %v3444_v6  ;;  %v3445_v0 = vunpack.i.l.bf16 %v3444_v6 }
 0x159   : > { %v1851_v49 = vsel %vm1824_vm7, %v1818_v57, %v3450_v48  ;;  %v1852_v35 = vsel %vm1824_vm7, %v1819_v55, %v3451_v43  ;;  %v5063_v55 = vld [vmem:[#allocation10_spill] sm:$0xff]  ;;  %v5066_v43 = vld [vmem:[#allocation9_spill] sm:$0xff] }
 0x15a   : > { %v3459_v3 = vpop.permute.xlu1 %3458  ;;  %v1835_v4 = vsel %vm1824_vm7, %v1802_v34, %v3445_v0  ;;  %v1836_v58 = vsel %vm1824_vm7, %v1803_v37, %v3446_v42  ;;  %v5067_v42 = vld [vmem:[#allocation20_spill] sm:$0xff] }
 0x15b   : > { %v3461_v8 = vunpack.i.h.bf16 %v3459_v3  ;;  %v3460_v36 = vunpack.i.l.bf16 %v3459_v3  ;;  %v3454_v13 = vpop.permute.xlu0 %3453 }
 0x15c   : > { %v3456_v32 = vunpack.i.h.bf16 %v3454_v13  ;;  %v3455_v5 = vunpack.i.l.bf16 %v3454_v13 }
 0x15d   : > { %v1882_v56 = vsel %vm1857_vm8, %v1849_v21, %v3460_v36  ;;  %v1883_v40 = vsel %vm1857_vm8, %v1850_v11, %v3461_v8  ;;  %v5064_v11 = vld [vmem:[#allocation11_spill] sm:$0xff]  ;;  %v5065_v36 = vld [vmem:[#allocation8_spill] sm:$0xff] }
 0x15e   : > { %v1902_v10 = vpack.c.bf16 %v1883_v40, %v1882_v56  ;;  %v1866_v38 = vsel %vm1857_vm8, %v1833_v2, %v3455_v5  ;;  %v1867_v45 = vsel %vm1857_vm8, %v1834_v22, %v3456_v32  ;;  %v3469_v30 = vpop.permute.xlu1 %3468  ;;  %v5068_v56 = vld [vmem:[#allocation21_spill] sm:$0xff] }
 0x15f   : > { %v1894_v26 = vpack.c.bf16 %v1867_v45, %v1866_v38  ;;  %v3471_v53 = vunpack.i.h.bf16 %v3469_v30  ;;  %v3470_v20 = vunpack.i.l.bf16 %v3469_v30  ;;  %v3464_v16 = vpop.permute.xlu0 %3463  ;;  %v5069_v30 = vld [vmem:[#allocation18_spill] sm:$0xff] }
 0x160   : > { %v3466_v7 = vunpack.i.h.bf16 %v3464_v16  ;;  %v3465_v41 = vunpack.i.l.bf16 %v3464_v16  ;;  %2860 = vmatprep.mubr.msk.bf16.mxu1 %vm1933_vm9, %v1902_v10 }
 0x161   : > { %v1884_v15 = vsel %vm1857_vm8, %v1851_v49, %v3470_v20  ;;  %v1885_v46 = vsel %vm1857_vm8, %v1852_v35, %v3471_v53  ;;  %2844 = vmatprep.mubr.msk.bf16.mxu0 %vm1933_vm9, %v1894_v26  ;;  %v5070_v26 = vld [vmem:[#allocation19_spill] sm:$0xff] }
 0x162   : > { %v1903_v62 = vpack.c.bf16 %v1885_v46, %v1884_v15  ;;  %v1868_v19 = vsel %vm1857_vm8, %v1835_v4, %v3465_v41  ;;  %v1869_v14 = vsel %vm1857_vm8, %v1836_v58, %v3466_v7  ;;  %v3479_v28 = vpop.permute.xlu1 %3478 }
 0x163   : > { %v1895_v17 = vpack.c.bf16 %v1869_v14, %v1868_v19  ;;  %v3474_v60 = vpop.permute.xlu0 %3473  ;;  %v3481_v54 = vunpack.i.h.bf16 %v3479_v28  ;;  %v3480_v6 = vunpack.i.l.bf16 %v3479_v28 }
 0x164   : > { %2861 = vmatmul.mubr.msk.bf16.gmra.mrb[8].mxu1 %vm1933_vm9, %v1903_v62  ;;  %v3476_v50 = vunpack.i.h.bf16 %v3474_v60  ;;  %v3475_v33 = vunpack.i.l.bf16 %v3474_v60 }
 0x165   : > { %2845 = vmatmul.mubr.msk.bf16.gmra.mrb[8].mxu0 %vm1933_vm9, %v1895_v17  ;;  %v1723_v13 = vsel %vm1692_vm3, %v5065_v36, %v3480_v6  ;;  %v1724_v48 = vsel %vm1692_vm3, %v5066_v43, %v3481_v54 }
 0x166   : > { %v3489_v59 = vpop.permute.xlu1 %3488  ;;  %v1721_v21 = vsel %vm1692_vm3, %v5063_v55, %v3475_v33  ;;  %v1722_v3 = vsel %vm1692_vm3, %v5064_v11, %v3476_v50 }
 0x167   : > { %v3484_v51 = vpop.permute.xlu0 %3483  ;;  %v3491_v24 = vunpack.i.h.bf16 %v3489_v59  ;;  %v3490_v1 = vunpack.i.l.bf16 %v3489_v59 }
 0x168   : > { %v3486_v47 = vunpack.i.h.bf16 %v3484_v51  ;;  %v3485_v27 = vunpack.i.l.bf16 %v3484_v51 }
 0x169   : > { %v1754_v32 = vsel %vm1725_vm4, %v1721_v21, %v3490_v1  ;;  %v1755_v5 = vsel %vm1725_vm4, %v1722_v3, %v3491_v24 }
 0x16a   : > { %v3499_v39 = vpop.permute.xlu1 %3498  ;;  %v1738_v0 = vsel %vm1725_vm4, %v5067_v42, %v3485_v27  ;;  %v1739_v40 = vsel %vm1725_vm4, %v5068_v56, %v3486_v47 }
 0x16b   : > { %v3494_v29 = vpop.permute.xlu0 %3493  ;;  %v3501_v61 = vunpack.i.h.bf16 %v3499_v39  ;;  %v3500_v18 = vunpack.i.l.bf16 %v3499_v39 }
 0x16c   : > { %v3496_v23 = vunpack.i.h.bf16 %v3494_v29  ;;  %v3495_v31 = vunpack.i.l.bf16 %v3494_v29 }
 0x16d   : > { %v1756_v38 = vsel %vm1725_vm4, %v1723_v13, %v3500_v18  ;;  %v1757_v45 = vsel %vm1725_vm4, %v1724_v48, %v3501_v61 }
 0x16e   : > { %v3509_v25 = vpop.permute.xlu1 %3508  ;;  %v1740_v37 = vsel %vm1725_vm4, %v5069_v30, %v3495_v31  ;;  %v1741_v53 = vsel %vm1725_vm4, %v5070_v26, %v3496_v23 }
 0x16f   : > { %v3504_v52 = vpop.permute.xlu0 %3503  ;;  %v3511_v2 = vunpack.i.h.bf16 %v3509_v25  ;;  %v3510_v22 = vunpack.i.l.bf16 %v3509_v25 }
 0x170   : > { %v3506_v34 = vunpack.i.h.bf16 %v3504_v52  ;;  %v3505_v10 = vunpack.i.l.bf16 %v3504_v52 }
 0x171   : > { %v1787_v16 = vsel %vm1758_vm5, %v1754_v32, %v3510_v22  ;;  %v1788_v49 = vsel %vm1758_vm5, %v1755_v5, %v3511_v2 }
 0x172   : > { %v3519_v9 = vpop.permute.xlu1 %3518  ;;  %v1771_v62 = vsel %vm1758_vm5, %v1738_v0, %v3505_v10  ;;  %v1772_v19 = vsel %vm1758_vm5, %v1739_v40, %v3506_v34 }
 0x173   : > { %v3514_v44 = vpop.permute.xlu0 %3513  ;;  %v3521_v35 = vunpack.i.h.bf16 %v3519_v9  ;;  %v3520_v7 = vunpack.i.l.bf16 %v3519_v9 }
 0x174   : > { %v3516_v4 = vunpack.i.h.bf16 %v3514_v44  ;;  %v3515_v58 = vunpack.i.l.bf16 %v3514_v44 }
 0x175   : > { %v1789_v29 = vsel %vm1758_vm5, %v1756_v38, %v3520_v7  ;;  %v1790_v25 = vsel %vm1758_vm5, %v1757_v45, %v3521_v35 }
 0x176   : > { %v3529_v63 = vpop.permute.xlu1 %3528  ;;  %v1774_v50 = vsel %vm1758_vm5, %v1741_v53, %v3516_v4 }
 0x177   : > { %v3524_v12 = vpop.permute.xlu0 %3523  ;;  %v3531_v15 = vunpack.i.h.bf16 %v3529_v63  ;;  %v3530_v46 = vunpack.i.l.bf16 %v3529_v63  ;;  %v1773_v63 = vsel %vm1758_vm5, %v1740_v37, %v3515_v58 }
 0x178   : > { %v3526_v14 = vunpack.i.h.bf16 %v3524_v12  ;;  %v3525_v28 = vunpack.i.l.bf16 %v3524_v12 }
 0x179   : > { %v1820_v33 = vsel %vm1791_vm6, %v1787_v16, %v3530_v46  ;;  %v1821_v12 = vsel %vm1791_vm6, %v1788_v49, %v3531_v15  ;;  %v4883_v15 = vld [vmem:[%s5008_s2] ss:$0 sm:$0xff] }
 0x17a   : > { %v3539_v57 = vpop.permute.xlu1 %3538  ;;  %v1804_v54 = vsel %vm1791_vm6, %v1771_v62, %v3525_v28  ;;  %v1805_v6 = vsel %vm1791_vm6, %v1772_v19, %v3526_v14 }
 0x17b   : > { %v4824_v8 = vpop.permute.xlu0 %3533  ;;  %v3541_v17 = vunpack.i.h.bf16 %v3539_v57  ;;  %v3540_v60 = vunpack.i.l.bf16 %v3539_v57 }
 0x17c   : > { %v3536_v24 = vunpack.i.h.bf16 %v4824_v8  ;;  %v3535_v1 = vunpack.i.l.bf16 %v4824_v8 }
 0x17d   : > { %v1822_v47 = vsel %vm1791_vm6, %v1789_v29, %v3540_v60  ;;  %v1823_v27 = vsel %vm1791_vm6, %v1790_v25, %v3541_v17 }
 0x17e   : > { %v3549_v20 = vpop.permute.xlu1 %3548  ;;  %v1806_v32 = vsel %vm1791_vm6, %v1773_v63, %v3535_v1  ;;  %v1807_v40 = vsel %vm1791_vm6, %v1774_v50, %v3536_v24 }
 0x17f   : > { %v3544_v41 = vpop.permute.xlu0 %3543  ;;  %v3551_v59 = vunpack.i.h.bf16 %v3549_v20  ;;  %v3550_v51 = vunpack.i.l.bf16 %v3549_v20 }
 0x180   : > { %v3546_v52 = vunpack.i.h.bf16 %v3544_v41  ;;  %v3545_v9 = vunpack.i.l.bf16 %v3544_v41 }
 0x181   : > { %v1853_v61 = vsel %vm1824_vm7, %v1820_v33, %v3550_v51  ;;  %v1854_v18 = vsel %vm1824_vm7, %v1821_v12, %v3551_v59 }
 0x182   : > { %v3559_v39 = vpop.permute.xlu1 %3558  ;;  %v1837_v31 = vsel %vm1824_vm7, %v1804_v54, %v3545_v9  ;;  %v1838_v57 = vsel %vm1824_vm7, %v1805_v6, %v3546_v52 }
 0x183   : > { %v3554_v44 = vpop.permute.xlu0 %3553  ;;  %v3561_v3 = vunpack.i.h.bf16 %v3559_v39  ;;  %v3560_v2 = vunpack.i.l.bf16 %v3559_v39 }
 0x184   : > { %v3556_v36 = vunpack.i.h.bf16 %v3554_v44  ;;  %v3555_v13 = vunpack.i.l.bf16 %v3554_v44 }
 0x185   : > { %v1855_v30 = vsel %vm1824_vm7, %v1822_v47, %v3560_v2  ;;  %v1856_v37 = vsel %vm1824_vm7, %v1823_v27, %v3561_v3 }
 0x186   : > { %v3569_v23 = vpop.permute.xlu1 %3568  ;;  %v1839_v20 = vsel %vm1824_vm7, %v1806_v32, %v3555_v13  ;;  %v1840_v16 = vsel %vm1824_vm7, %v1807_v40, %v3556_v36 }
 0x187   : > { %v3571_v55 = vunpack.i.h.bf16 %v3569_v23  ;;  %v3570_v21 = vunpack.i.l.bf16 %v3569_v23  ;;  %v3564_v11 = vpop.permute.xlu0 %3563 }
 0x188   : > { %v3566_v22 = vunpack.i.h.bf16 %v3564_v11  ;;  %v3565_v8 = vunpack.i.l.bf16 %v3564_v11 }
 0x189   : > { %v1886_v43 = vsel %vm1857_vm8, %v1853_v61, %v3570_v21  ;;  %v1887_v48 = vsel %vm1857_vm8, %v1854_v18, %v3571_v55 }
 0x18a   : > { %v1904_v5 = vpack.c.bf16 %v1887_v48, %v1886_v43  ;;  %v1870_v42 = vsel %vm1857_vm8, %v1837_v31, %v3565_v8  ;;  %v1871_v0 = vsel %vm1857_vm8, %v1838_v57, %v3566_v22  ;;  %v3579_v56 = vpop.permute.xlu1 %3578 }
 0x18b   : > { %v1896_v34 = vpack.c.bf16 %v1871_v0, %v1870_v42  ;;  %v3581_v10 = vunpack.i.h.bf16 %v3579_v56  ;;  %v3580_v38 = vunpack.i.l.bf16 %v3579_v56  ;;  %v3574_v45 = vpop.permute.xlu0 %3573 }
 0x18c   : > { %v3576_v26 = vunpack.i.h.bf16 %v3574_v45  ;;  %v3575_v53 = vunpack.i.l.bf16 %v3574_v45  ;;  %2864 = vmatprep.mubr.msk.bf16.mxu1 %vm1933_vm9, %v1904_v5 }
 0x18d   : > { %v1888_v49 = vsel %vm1857_vm8, %v1855_v30, %v3580_v38  ;;  %v1889_v35 = vsel %vm1857_vm8, %v1856_v37, %v3581_v10  ;;  %2848 = vmatprep.mubr.msk.bf16.mxu0 %vm1933_vm9, %v1896_v34 }
 0x18e   : > { %v1905_v7 = vpack.c.bf16 %v1889_v35, %v1888_v49  ;;  %v1872_v41 = vsel %vm1857_vm8, %v1839_v20, %v3575_v53  ;;  %v1873_v4 = vsel %vm1857_vm8, %v1840_v16, %v3576_v26 }
 0x18f   : > { %v1897_v58 = vpack.c.bf16 %v1873_v4, %v1872_v41 }
 0x190   : > { %2865 = vmatmul.mubr.msk.bf16.gmra.mrb[12].mxu1 %vm1933_vm9, %v1905_v7 }
 0x191   : > { %2849 = vmatmul.mubr.msk.bf16.gmra.mrb[12].mxu0 %vm1933_vm9, %v1897_v58 }
 0x1e7   : > { %v2854_v46 = vpop.f32.mrb[0].mxu1 }
 0x1e8   : > { %v2838_v62 = vpop.f32.mrb[0].mxu0  ;;  %v2084_v19 = vpop.f32.mrb[1].mxu1  ;;  %v2093_v39 = vadd.f32 %v2854_v46, %v4883_v15 }
 0x1e9   : > { %v2020_v14 = vpop.f32.mrb[1].mxu0  ;;  %v2085_v28 = vadd.f32 %v4883_v15, %v2084_v19  ;;  %v2855_v17 = vpop.f32.mrb[2].mxu1  ;;  %v2029_v52 = vadd.f32 %v2838_v62, %v4883_v15 }
 0x1ea   : > { %v2021_v60 = vadd.f32 %v4883_v15, %v2020_v14  ;;  %v2839_v59 = vpop.f32.mrb[2].mxu0  ;;  %v2087_v51 = vpop.f32.mrb[3].mxu1  ;;  %v2096_v63 = vadd.f32 %v2855_v17, %v4883_v15  ;;  %v2165_v6 = vmax.f32 %v2093_v39, 0.0 }
 0x1eb   : > { %v2023_v29 = vpop.f32.mrb[3].mxu0  ;;  %v2088_v25 = vadd.f32 %v4883_v15, %v2087_v51  ;;  %v2163_v44 = vmax.f32 %v2085_v28, 0.0  ;;  %v2032_v12 = vadd.f32 %v2839_v59, %v4883_v15  ;;  %v2149_v1 = vmax.f32 %v2029_v52, 0.0 }
 0x1ec   : > { %v2024_v9 = vadd.f32 %v4883_v15, %v2023_v29  ;;  %v2147_v33 = vmax.f32 %v2021_v60, 0.0  ;;  %v2166_v27 = vmax.f32 %v2096_v63, 0.0 }
 0x1ed   : > { %v2164_v50 = vmax.f32 %v2088_v25, 0.0  ;;  %v2150_v18 = vmax.f32 %v2032_v12, 0.0 }
 0x1ee   : > { %v2148_v54 = vmax.f32 %v2024_v9, 0.0 }
 0x1ef   : > { %v2201_v24 = vadd.f32 %v2164_v50, %v2163_v44 }
 0x1f0   : > { %v2180_v47 = vadd.f32 %v2148_v54, %v2147_v33 }
 0x1f1   : > { %v2202_v61 = vadd.f32 %v2201_v24, %v2165_v6 }
 0x1f2   : > { %v2181_v23 = vadd.f32 %v2180_v47, %v2149_v1 }
 0x1f3   : > { %v2203_v31 = vadd.f32 %v2202_v61, %v2166_v27 }
 0x1f4   : > { %v2182_v57 = vadd.f32 %v2181_v23, %v2150_v18 }
 0x20f   : > { %v2858_v55 = vpop.f32.mrb[4].mxu1 }
 0x210   : > { %v2842_v21 = vpop.f32.mrb[4].mxu0  ;;  %v2100_v11 = vpop.f32.mrb[5].mxu1  ;;  %v2109_v43 = vadd.f32 %v2858_v55, %v4883_v15 }
 0x211   : > { %v2036_v3 = vpop.f32.mrb[5].mxu0  ;;  %v2101_v2 = vadd.f32 %v4883_v15, %v2100_v11  ;;  %v2859_v22 = vpop.f32.mrb[6].mxu1  ;;  %v2045_v42 = vadd.f32 %v2842_v21, %v4883_v15 }
 0x212   : > { %v2037_v8 = vadd.f32 %v4883_v15, %v2036_v3  ;;  %v2843_v36 = vpop.f32.mrb[6].mxu0  ;;  %v2103_v13 = vpop.f32.mrb[7].mxu1  ;;  %v2112_v34 = vadd.f32 %v2859_v22, %v4883_v15  ;;  %v2169_v37 = vmax.f32 %v2109_v43, 0.0 }
 0x213   : > { %v2167_v48 = vmax.f32 %v2101_v2, 0.0  ;;  %v2039_v32 = vpop.f32.mrb[7].mxu0  ;;  %v2104_v5 = vadd.f32 %v4883_v15, %v2103_v13  ;;  %v2048_v45 = vadd.f32 %v2843_v36, %v4883_v15  ;;  %v2153_v53 = vmax.f32 %v2045_v42, 0.0 }
 0x214   : > { %v2151_v0 = vmax.f32 %v2037_v8, 0.0  ;;  %v2040_v56 = vadd.f32 %v4883_v15, %v2039_v32  ;;  %v2170_v16 = vmax.f32 %v2112_v34, 0.0 }
 0x215   : > { %v2204_v40 = vadd.f32 %v2203_v31, %v2167_v48  ;;  %v2168_v10 = vmax.f32 %v2104_v5, 0.0  ;;  %v2154_v35 = vmax.f32 %v2048_v45, 0.0 }
 0x216   : > { %v2183_v38 = vadd.f32 %v2182_v57, %v2151_v0  ;;  %v2152_v30 = vmax.f32 %v2040_v56, 0.0 }
 0x217   : > { %v2205_v26 = vadd.f32 %v2204_v40, %v2168_v10 }
 0x218   : > { %v2184_v20 = vadd.f32 %v2183_v38, %v2152_v30 }
 0x219   : > { %v2206_v49 = vadd.f32 %v2205_v26, %v2169_v37 }
 0x21a   : > { %v2185_v7 = vadd.f32 %v2184_v20, %v2153_v53 }
 0x21b   : > { %v2207_v41 = vadd.f32 %v2206_v49, %v2170_v16 }
 0x21c   : > { %v2186_v4 = vadd.f32 %v2185_v7, %v2154_v35 }
 0x237   : > { %v2862_v58 = vpop.f32.mrb[8].mxu1 }
 0x238   : > { %v2846_v46 = vpop.f32.mrb[8].mxu0  ;;  %v2116_v62 = vpop.f32.mrb[9].mxu1  ;;  %v2125_v51 = vadd.f32 %v2862_v58, %v4883_v15 }
 0x239   : > { %v2052_v19 = vpop.f32.mrb[9].mxu0  ;;  %v2117_v14 = vadd.f32 %v4883_v15, %v2116_v62  ;;  %v2863_v28 = vpop.f32.mrb[10].mxu1  ;;  %v2061_v52 = vadd.f32 %v2846_v46, %v4883_v15 }
 0x23a   : > { %v2053_v17 = vadd.f32 %v4883_v15, %v2052_v19  ;;  %v2847_v60 = vpop.f32.mrb[10].mxu0  ;;  %v2119_v59 = vpop.f32.mrb[11].mxu1  ;;  %v2128_v50 = vadd.f32 %v2863_v28, %v4883_v15  ;;  %v2173_v24 = vmax.f32 %v2125_v51, 0.0 }
 0x23b   : > { %v2171_v39 = vmax.f32 %v2117_v14, 0.0  ;;  %v2055_v29 = vpop.f32.mrb[11].mxu0  ;;  %v2120_v25 = vadd.f32 %v4883_v15, %v2119_v59  ;;  %v2064_v54 = vadd.f32 %v2847_v60, %v4883_v15  ;;  %v2157_v47 = vmax.f32 %v2061_v52, 0.0 }
 0x23c   : > { %v2155_v9 = vmax.f32 %v2053_v17, 0.0  ;;  %v2056_v44 = vadd.f32 %v4883_v15, %v2055_v29  ;;  %v2174_v61 = vmax.f32 %v2128_v50, 0.0  ;;  %v3594_v50 = vld [vmem:[%s5009_s3 + $0x8] sm:$0xff] (!%p2768_p4)  }
 0x23d   : > { %v2208_v63 = vadd.f32 %v2207_v41, %v2171_v39  ;;  %v2172_v33 = vmax.f32 %v2120_v25, 0.0  ;;  %v2158_v23 = vmax.f32 %v2064_v54, 0.0  ;;  %v2179_v25 = vld [vmem:[#allocation2] sm:$0x3] }
 0x23e   : > { %v2187_v12 = vadd.f32 %v2186_v4, %v2155_v9  ;;  %v2156_v6 = vmax.f32 %v2056_v44, 0.0  ;;  %v3593_v44 = vld [vmem:[%s5009_s3] sm:$0xff] (!%p2768_p4)  }
 0x23f   : > { %v2209_v1 = vadd.f32 %v2208_v63, %v2172_v33  ;;  %v3658_v63 = vmov (!%p2768_p4), 0.0   ;;  %v3595_v33 = vld [vmem:[%s5009_s3 + $0x10] sm:$0xff] (!%p2768_p4)   ;;  %v3597_v54 = vld [vmem:[%s5009_s3 + $0x20] sm:$0xff] (!%p2768_p4)  }
 0x240   : > { %v2188_v27 = vadd.f32 %v2187_v12, %v2156_v6  ;;  %2868 = vmatprep.subr.bf16.mxu0 (!%p2768_p4), %v3658_v63  ;;  %2888 = vmatprep.subr.bf16.mxu1 (!%p2768_p4), %v3658_v63  ;;  %v3596_v12 = vld [vmem:[%s5009_s3 + $0x18] sm:$0xff] (!%p2768_p4)   ;;  %v3598_v6 = vld [vmem:[%s5009_s3 + $0x28] sm:$0xff] (!%p2768_p4)  }
 0x241   : > { %v2210_v18 = vadd.f32 %v2209_v1, %v2173_v24  ;;  %2869 = vmatpush3.bf16.msra.mxu0 (!%p2768_p4), %v3593_v44  ;;  %2884 = vmatprep.mubr.msk.bf16.mxu0 (!%p2768_p4), %vm3659_vm11, %v3658_v63  ;;  %v3599_v24 = vld [vmem:[%s5009_s3 + $0x30] sm:$0xff] (!%p2768_p4)  }
 0x242   : > { %v2189_v31 = vadd.f32 %v2188_v27, %v2157_v47  ;;  %2870 = vmatprep.subr.bf16.mxu0 (!%p2768_p4), %v3658_v63  ;;  %2904 = vmatprep.mubr.msk.bf16.mxu1 (!%p2768_p4), %vm3659_vm11, %v3658_v63  ;;  %v3600_v27 = vld [vmem:[%s5009_s3 + $0x38] sm:$0xff] (!%p2768_p4)  }
 0x243   : > { %v2211_v57 = vadd.f32 %v2210_v18, %v2174_v61  ;;  %v3601_v18 = vld [vmem:[%s5013_s7] sm:$0xff] (!%p2768_p4)  }
 0x244   : > { %v2190_v55 = vadd.f32 %v2189_v31, %v2158_v23  ;;  %2889 = vmatpush3.bf16.msra.mxu1 (!%p2768_p4), %v3601_v18  ;;  %v3602_v23 = vld [vmem:[%s5013_s7 + $0x8] sm:$0xff] (!%p2768_p4)   ;;  %v3603_v31 = vld [vmem:[%s5013_s7 + $0x10] sm:$0xff] (!%p2768_p4)  }
 0x245   : > { %2871 = vmatpush3.bf16.msra.mxu0 (!%p2768_p4), %v3594_v50  ;;  %2890 = vmatprep.subr.bf16.mxu1 (!%p2768_p4), %v3658_v63 }
 0x246   : > { %2872 = vmatprep.subr.bf16.mxu0 (!%p2768_p4), %v3658_v63 }
 0x248   : > { %2891 = vmatpush3.bf16.msra.mxu1 (!%p2768_p4), %v3602_v23 }
 0x249   : > { %2873 = vmatpush3.bf16.msra.mxu0 (!%p2768_p4), %v3595_v33  ;;  %2892 = vmatprep.subr.bf16.mxu1 (!%p2768_p4), %v3658_v63 }
 0x24a   : > { %2874 = vmatprep.subr.bf16.mxu0 (!%p2768_p4), %v3658_v63 }
 0x24c   : > { %2893 = vmatpush3.bf16.msra.mxu1 (!%p2768_p4), %v3603_v31 }
 0x24d   : > { %2875 = vmatpush3.bf16.msra.mxu0 (!%p2768_p4), %v3596_v12  ;;  %2894 = vmatprep.subr.bf16.mxu1 (!%p2768_p4), %v3658_v63 }
 0x24e   : > { %2876 = vmatprep.subr.bf16.mxu0 (!%p2768_p4), %v3658_v63 }
 0x251   : > { %2877 = vmatpush3.bf16.msra.mxu0 (!%p2768_p4), %v3597_v54 }
 0x252   : > { %2878 = vmatprep.subr.bf16.mxu0 (!%p2768_p4), %v3658_v63 }
 0x255   : > { %2879 = vmatpush3.bf16.msra.mxu0 (!%p2768_p4), %v3598_v6 }
 0x256   : > { %2880 = vmatprep.subr.bf16.mxu0 (!%p2768_p4), %v3658_v63 }
 0x259   : > { %2881 = vmatpush3.bf16.msra.mxu0 (!%p2768_p4), %v3599_v24 }
 0x25a   : > { %2882 = vmatprep.subr.bf16.mxu0 (!%p2768_p4), %v3658_v63 }
 0x25d   : > { %2883 = vmatpush3.bf16.msra.mxu0 (!%p2768_p4), %v3600_v27 }
 0x263   : > { %v2866_v21 = vpop.f32.mrb[12].mxu1 }
 0x264   : > { %v2850_v11 = vpop.f32.mrb[12].mxu0  ;;  %v2132_v3 = vpop.f32.mrb[13].mxu1  ;;  %v2141_v48 = vadd.f32 %v2866_v21, %v4883_v15  ;;  %v3606_v21 = vld [vmem:[%s5013_s7 + $0x28] sm:$0xff] (!%p2768_p4)  }
 0x265   : > { %v2068_v2 = vpop.f32.mrb[13].mxu0  ;;  %v2133_v22 = vadd.f32 %v4883_v15, %v2132_v3  ;;  %v2867_v8 = vpop.f32.mrb[14].mxu1  ;;  %v2077_v0 = vadd.f32 %v2850_v11, %v4883_v15  ;;  %v3607_v11 = vld [vmem:[%s5013_s7 + $0x30] sm:$0xff] (!%p2768_p4)   ;;  %v3608_v3 = vld [vmem:[%s5013_s7 + $0x38] sm:$0xff] (!%p2768_p4)  }
 0x266   : > { %v2069_v36 = vadd.f32 %v4883_v15, %v2068_v2  ;;  %v2851_v13 = vpop.f32.mrb[14].mxu0  ;;  %v2135_v43 = vpop.f32.mrb[15].mxu1  ;;  %v2144_v10 = vadd.f32 %v2867_v8, %v4883_v15  ;;  %v2177_v26 = vmax.f32 %v2141_v48, 0.0  ;;  %v2769_v2 = vld [vmem:[%s5010_s4] ss:$0 sm:$0xff] (!%p2768_p4) }
 0x267   : > { %v2175_v32 = vmax.f32 %v2133_v22, 0.0  ;;  %v2071_v5 = vpop.f32.mrb[15].mxu0  ;;  %v2136_v42 = vadd.f32 %v4883_v15, %v2135_v43  ;;  %v2080_v30 = vadd.f32 %v2851_v13, %v4883_v15  ;;  %v2161_v20 = vmax.f32 %v2077_v0, 0.0 }
 0x268   : > { %v2159_v56 = vmax.f32 %v2069_v36, 0.0  ;;  %v2072_v40 = vadd.f32 %v4883_v15, %v2071_v5  ;;  %v2178_v49 = vmax.f32 %v2144_v10, 0.0 }
 0x269   : > { %v2212_v34 = vadd.f32 %v2211_v57, %v2175_v32  ;;  %v2176_v38 = vmax.f32 %v2136_v42, 0.0  ;;  %v2162_v7 = vmax.f32 %v2080_v30, 0.0  ;;  %v3604_v57 = vld [vmem:[%s5013_s7 + $0x18] sm:$0xff] (!%p2768_p4)  }
 0x26a   : > { %v2191_v45 = vadd.f32 %v2190_v55, %v2159_v56  ;;  %v2160_v37 = vmax.f32 %v2072_v40, 0.0  ;;  %2895 = vmatpush3.bf16.msra.mxu1 (!%p2768_p4), %v3604_v57  ;;  %v3605_v55 = vld [vmem:[%s5013_s7 + $0x20] sm:$0xff] (!%p2768_p4)  }
 0x26b   : > { %v2213_v53 = vadd.f32 %v2212_v34, %v2176_v38  ;;  %2896 = vmatprep.subr.bf16.mxu1 (!%p2768_p4), %v3658_v63 }
 0x26c   : > { %v2192_v16 = vadd.f32 %v2191_v45, %v2160_v37 }
 0x26d   : > { %v2214_v35 = vadd.f32 %v2213_v53, %v2177_v26 }
 0x26e   : > { %v2193_v41 = vadd.f32 %v2192_v16, %v2161_v20  ;;  %2897 = vmatpush3.bf16.msra.mxu1 (!%p2768_p4), %v3605_v55 }
 0x26f   : > { %v2215_v4 = vadd.f32 %v2214_v35, %v2178_v49  ;;  %2898 = vmatprep.subr.bf16.mxu1 (!%p2768_p4), %v3658_v63 }
 0x270   : > { %v2194_v58 = vadd.f32 %v2193_v41, %v2162_v7 }
 0x271   : > { %v2216_v46 = vrot.slane %v2215_v4, 4 }
 0x272   : > { %v2195_v62 = vrot.slane %v2194_v58, 4  ;;  %2899 = vmatpush3.bf16.msra.mxu1 (!%p2768_p4), %v3606_v21 }
 0x273   : > { %v2217_v19 = vadd.f32 %v2216_v46, %v2215_v4  ;;  %2900 = vmatprep.subr.bf16.mxu1 (!%p2768_p4), %v3658_v63  ;;  %v2778_v46 = vld [vmem:[%s5011_s5] ss:$0 sm:$0xff] (!%p2768_p4) }
 0x274   : > { %v2196_v14 = vadd.f32 %v2195_v62, %v2194_v58 }
 0x275   : > { %v2218_v28 = vrot.slane %v2217_v19, 2 }
 0x276   : > { %v2197_v17 = vrot.slane %v2196_v14, 2  ;;  %2901 = vmatpush3.bf16.msra.mxu1 (!%p2768_p4), %v3607_v11 }
 0x277   : > { %v2219_v60 = vadd.f32 %v2218_v28, %v2217_v19  ;;  %2902 = vmatprep.subr.bf16.mxu1 (!%p2768_p4), %v3658_v63  ;;  %v2779_v19 = vld [vmem:[%s5012_s6] ss:$0 sm:$0xff] (!%p2768_p4) }
 0x278   : > { %v2198_v59 = vadd.f32 %v2197_v17, %v2196_v14 }
 0x279   : > { %v2220_v15 = vrot.slane %v2219_v60, 1 }
 0x27a   : > { %v2199_v51 = vrot.slane %v2198_v59, 1  ;;  %2903 = vmatpush3.bf16.msra.mxu1 (!%p2768_p4), %v3608_v3 }
 0x27b   : > { %v2221_v39 = vadd.f32 %v2220_v15, %v2219_v60  ;;  %2232 = sbr.rel (%p2768_p4) target bundleno = 1126 (0x466), region = 64 }
 0x27c   : > { %v2200_v29 = vadd.f32 %v2199_v51, %v2198_v59  ;;  %v2780_v59 = vld [vmem:[%s5014_s8] ss:$0 sm:$0xff] (!%p2768_p4) }
 0x27e   : > { %v2225_v52 = vsel %vm2224_vm10, %v2221_v39, %v2200_v29 }
 0x27f   : > { %v2227_v9 = vadd.f32 %v2225_v52, %v2179_v25 }
 0x281   : > { %2228 = vst [vmem:[#allocation2] sm:$0x3] %v2227_v9 }
 0x288   : > { %v2233_v1 = vld [vmem:[#allocation2] sm:$0x3] }
 0x289   : > { %v2234_v47 = vmul.f32 0.00390625, %v2233_v1 }
 0x28b   : > { %v2235_v61 = vpack.c.bf16 %v2234_v47, %v2234_v47 }
 0x28d   : > { %2885 = vmatmul.mubr.bf16.vlgmr.msra.gmra.mrb[0].mxu0 %v2235_v61 }
 0x360   : > { %v2341_v22 = vpop.f32.mrb[0].mxu0 }
 0x361   : > { %v2342_v8 = vadd.f32 %v2769_v2, %v2341_v22  ;;  %v2886_v36 = vpop.f32.mrb[1].mxu0 }
 0x362   : > { %v2344_v13 = vpop.f32.mrb[2].mxu0 }
 0x363   : > { %v2347_v43 = vsel %vm1982_vm0, %v2342_v8, 0.0  ;;  %v2356_v48 = vmul.f32 %v2342_v8, %v2342_v8  ;;  %v2887_v32 = vpop.f32.mrb[3].mxu0 }
 0x364   : > { %v2348_v5 = vrot.slane %v2347_v43, 4 }
 0x365   : > { %v2357_v42 = vsel %vm1982_vm0, %v2356_v48, 0.0 }
 0x366   : > { %v2349_v0 = vadd.f32 %v2348_v5, %v2347_v43  ;;  %v2358_v56 = vrot.slane %v2357_v42, 4 }
 0x368   : > { %v2350_v40 = vrot.slane %v2349_v0, 2  ;;  %v2359_v34 = vadd.f32 %v2358_v56, %v2357_v42 }
 0x36a   : > { %v2351_v10 = vadd.f32 %v2350_v40, %v2349_v0  ;;  %v2360_v38 = vrot.slane %v2359_v34, 2 }
 0x36c   : > { %v2352_v45 = vrot.slane %v2351_v10, 1  ;;  %v2361_v30 = vadd.f32 %v2360_v38, %v2359_v34 }
 0x36e   : > { %v2353_v37 = vadd.f32 %v2352_v45, %v2351_v10  ;;  %v2362_v26 = vrot.slane %v2361_v30, 1 }
 0x370   : > { %v2355_v53 = vmul.f32 0.5, %v2353_v37  ;;  %v2363_v20 = vadd.f32 %v2362_v26, %v2361_v30 }
 0x372   : > { %v2364_v16 = vmul.f32 0.5, %v2363_v20  ;;  %v2365_v49 = vmul.f32 %v2355_v53, %v2355_v53  ;;  %v2368_v4 = vsub.f32 %v2342_v8, %v2355_v53 }
 0x374   : > { %v2366_v35 = vsub.f32 %v2364_v16, %v2365_v49 }
 0x376   : > { %v2367_v7 = vmax.f32 %v2366_v35, 0.0 }
 0x378   : > { %v2369_v41 = vadd.f32 1e-05, %v2367_v7 }
 0x37a   : > { %3609 = vrsqrt.f32 %v2369_v41 }
 0x384   : > { %v3610_v58 = vpop.eup %3609 }
 0x385   : > { %v2371_v62 = vmul.f32 %v3610_v58, %v2368_v4 }
 0x387   : > { %v2379_v14 = vmul.f32 %v2778_v46, %v2371_v62 }
 0x389   : > { %v2387_v28 = vadd.f32 %v2779_v19, %v2379_v14 }
 0x38b   : > { %v2388_v17 = vmax.f32 %v2387_v28, 0.0 }
 0x38d   : > { %v2389_v60 = vpack.c.bf16 %v2388_v17, %v2388_v17 }
 0x38f   : > { %2905 = vmatmul.mubr.bf16.vlgmr.msra.gmra.mrb[0].mxu1 %v2389_v60 }
 0x462   : > { %v2495_v15 = vpop.f32.mrb[0].mxu1 }
 0x463   : > { %v2496_v51 = vadd.f32 %v2780_v59, %v2495_v15  ;;  %v2906_v39 = vpop.f32.mrb[1].mxu1 }
 0x464   : > { %v2498_v29 = vpop.f32.mrb[2].mxu1 }
 0x465   : > { %2501 = vst [vmem:[#allocation3] sm:$0x3] %v2496_v51  ;;  %v2907_v25 = vpop.f32.mrb[3].mxu1 }
 0x466 PF: > { %p2920_p5 = scmp.eq.s32.totalorder %s3717_s10, 1  ;;  %s3660_s14 = smov [#allocation3]  }
 0x467   : > { %s2509_s15 = sshll.u32 %s3660_s14, 4  ;;  %s2510_s15 = int_to_ptr.vmem [resolvable:$true] %s2509_s15 }
 0x468   : > { %s3611_s16 = scalar_lea.vmem %s2510_s15, 32  ;;  %p3618_p9 = scmp.lt.s32.totalorder %s2510_s15, %s2510_s15 }
 0x469   : > { %p3612_p6 = scmp.ne.s32.totalorder %s2510_s15, %s3611_s16  ;;  %p3619_p10 = scmp.lt.s32.totalorder %s3611_s16, %s3611_s16 }
 0x46b   : > { %p3613_p7 = pnand %p3612_p6, %p2920_p5  ;;  %p3620_p11 = por %p3619_p10, %p3618_p9 }
 0x46d   : > { %p3614_p8 = pneg %p3613_p7 }
 0x46f   : > { %p3621_p12 = pnand %p3620_p11, %p3614_p8 }
 0x471   : > { %3624 = shalt.err (!%p3621_p12)
}
 0x472   : > { %s3625_s19 = scalar_lea.hbm %s5015_s9, 32 }
 0x473   : > { %p3626_p13 = scmp.ne.s32.totalorder %s5015_s9, %s3625_s19  ;;  %p3631_p2 = scmp.lt.u32.totalorder %s3625_s19, %s5015_s9 }
 0x475   : > { %p3627_p0 = pnand %p3626_p13, %p2920_p5 }
 0x477   : > { %p3628_p1 = pneg %p3627_p0 }
 0x479   : > { %p3633_p3 = pnand %p3631_p2, %p3628_p1 }
 0x47b   : > { %3636 = shalt.err (!%p3633_p3)
}
 0x47c   : > { %2917 = dma.vmem_to_hbm [thread:$0]  (%p2920_p5), %s2510_s15, 32, %s5015_s9, [#allocation4]  }
 0x47d   : > { %3642 = dma.done.wait (%p2920_p5), [#allocation4], 32  }
 0x47e   : > { %3644 = vsyncadd (%p2920_p5), [#allocation4], 4294967264 }
 0x47f PF: > { %s20_s30 = sadd.s32 1, %s3647_s30  }
 0x480   : > { %p17_p4 = scmp.ge.s32.totalorder %s20_s30, 4  }
 0x482   :  { %19 = sbr.rel (!%p17_p4) target bundleno = 1 (0x1), region = 91 }
 0x489   :  { %2522 = vsyncpa [#allocation4], 1 }
 0x48a   :  { %2524 = vsyncpa [#allocation4 + $0x1], 1 }

</bundles_post_ra>
